<compile_context>
chip_gen: v7x
topology: tpu7x:2x2x1
jax: 0.10.0
libtpu: 0.0.40
codegen_flags: <defaults>
</compile_context>

<pallas_src>
import functools

import jax
import jax.numpy as jnp
from jax import lax
from jax.experimental import pallas as pl
from jax.experimental.pallas import tpu as pltpu


def _round_up(x, m):
    return ((x + m - 1) // m) * m


def _conv_bn_relu_kernel(x_ref, w_ref, shift_ref, o_ref, *, k, wp, tm, win):
    """One grid step: `tm` flattened output positions of one image.

    x_ref:     (1, Lp, Cin)        bf16  padded + flattened image (resident
                                         across the inner M-tile grid axis)
    w_ref:     (k*k, Cin, Coutp)   bf16  conv weights with BN scale folded in
    shift_ref: (1, Coutp)          f32   beta - running_mean * scale
    o_ref:     (1, tm, Coutp)      f32   lane-dense (Coutp % 128 == 0)
    """
    coutp = o_ref.shape[-1]
    m0 = pl.multiple_of(pl.program_id(1) * tm, tm)
    # Aligned dynamic slice covering this tile plus the (k-1) row/col halo.
    window = x_ref[0, pl.ds(m0, win), :]                       # (win, Cin)

    acc = jnp.zeros((tm, coutp), jnp.float32)
    # Conv as k*k shifted matmuls accumulated in f32 (MXU, bf16 operands).
    # TODO(synk): for very large Cin*k*k, add a K grid axis + VMEM accumulator.
    for kh in range(k):
        for kw in range(k):
            off = kh * wp + kw                                 # static shift
            tap = window[off:off + tm, :]                      # (tm, Cin)
            acc = acc + jnp.dot(tap, w_ref[kh * k + kw],
                                preferred_element_type=jnp.float32)

    y = acc + shift_ref[...]                                   # fused BN shift
    o_ref[0] = jnp.maximum(y, 0.0).astype(o_ref.dtype)         # fused ReLU


@functools.partial(jax.jit, static_argnames=("kernel", "stride", "tm_max"))
def con_bn_relu_forward(x_nchw, conv_w, gamma, beta, run_mean, run_var,
                        *, kernel, stride=1, tm_max=1024, eps=1e-5):
    n, cin, h, w = x_nchw.shape
    cout = conv_w.shape[0]
    k = kernel
    pad = (k - 1) // 2
    hp, wp = h + 2 * pad, w + 2 * pad
    ho1, wo1 = hp - k + 1, wp - k + 1          # stride-1 output extents

    # ---- BN (eval) folding: y = conv(x, W * scale) + shift --------------------
    scale = gamma / jnp.sqrt(run_var + eps)                    # (Cout,)  f32
    shift = beta - run_mean * scale                            # (Cout,)  f32

    coutp = _round_up(cout, 128)               # lane-dense output / MXU N dim
    w_scaled = conv_w * scale[:, None, None, None]             # fold BN scale
    w_kk = jnp.transpose(w_scaled, (2, 3, 1, 0)).reshape(k * k, cin, cout)
    w_kk = jnp.pad(w_kk, ((0, 0), (0, 0), (0, coutp - cout))).astype(jnp.bfloat16)
    shift_p = jnp.pad(shift, (0, coutp - cout)).reshape(1, coutp).astype(jnp.float32)

    # ---- padded NHWC input, flattened over (H, W) so a tap is a flat shift ----
    x_nhwc = jnp.transpose(x_nchw, (0, 2, 3, 1))
    x_pad = jnp.pad(x_nhwc, ((0, 0), (pad, pad), (pad, pad), (0, 0)))

    m = ho1 * wp                               # flattened outputs (incl. wrap cols)
    tm = min(_round_up(m, 8), tm_max)
    m_pad = _round_up(m, tm)
    halo = _round_up((k - 1) * (wp + 1), 8)
    lp = m_pad + halo
    win = tm + halo

    x_flat = x_pad.reshape(n, hp * wp, cin)
    x_flat = jnp.pad(x_flat, ((0, 0), (0, lp - hp * wp), (0, 0))).astype(jnp.bfloat16)

    kern = functools.partial(_conv_bn_relu_kernel, k=k, wp=wp, tm=tm, win=win)
    out_flat = pl.pallas_call(
        kern,
        out_shape=jax.ShapeDtypeStruct((n, m_pad, coutp), jnp.float32),
        grid=(n, m_pad // tm),
        in_specs=[
            # whole flattened image: resident across the inner M-tile axis
            pl.BlockSpec((1, lp, cin), lambda b, i: (b, 0, 0)),
            pl.BlockSpec((k * k, cin, coutp), lambda b, i: (0, 0, 0)),
            pl.BlockSpec((1, coutp), lambda b, i: (0, 0)),
        ],
        out_specs=pl.BlockSpec((1, tm, coutp), lambda b, i: (b, i, 0)),
        compiler_params=pltpu.CompilerParams(
            dimension_semantics=("parallel", "parallel"),
            vmem_limit_bytes=32 * 1024 * 1024),
    )(x_flat, w_kk, shift_p)

    # Drop Cout padding, wrap-around columns and M padding; back to NCHW.
    out = out_flat[:, :m, :cout].reshape(n, ho1, wp, cout)[:, :, :wo1, :]
    out = jnp.transpose(out, (0, 3, 1, 2))     # NCHW (module contract)
    if stride > 1:
        # TODO(synk): stride>1 is computed as a stride-1 conv + subsample
        # (correct but not compute-optimal); a strided tap kernel would avoid it.
        out = out[:, :, ::stride, ::stride]
    return out


# ----------------------------- references -----------------------------------
def _reference_f32(x, conv_w, gamma, beta, run_mean, run_var, *, stride, eps=1e-5):
    pad = (conv_w.shape[-1] - 1) // 2
    conv = lax.conv_general_dilated(
        x, conv_w, window_strides=(stride, stride),
        padding=((pad, pad), (pad, pad)),
        dimension_numbers=("NCHW", "OIHW", "NCHW"),
        precision=lax.Precision.HIGHEST)
    scale = (gamma / jnp.sqrt(run_var + eps)).reshape(1, -1, 1, 1)
    shift = beta.reshape(1, -1, 1, 1) - run_mean.reshape(1, -1, 1, 1) * scale
    return jnp.maximum(conv * scale + shift, 0.0)


def _reference_bf16(x, conv_w, gamma, beta, run_mean, run_var, *, stride, eps=1e-5):
    """Same op with the kernel's operand precision (bf16 inputs, f32 accum)."""
    pad = (conv_w.shape[-1] - 1) // 2
    scale = gamma / jnp.sqrt(run_var + eps)
    shift = (beta - run_mean * scale).reshape(1, -1, 1, 1)
    w_q = (conv_w * scale[:, None, None, None]).astype(jnp.bfloat16).astype(jnp.float32)
    x_q = x.astype(jnp.bfloat16).astype(jnp.float32)
    conv = lax.conv_general_dilated(
        x_q, w_q, window_strides=(stride, stride),
        padding=((pad, pad), (pad, pad)),
        dimension_numbers=("NCHW", "OIHW", "NCHW"),
        precision=lax.Precision.HIGHEST)
    return jnp.maximum(conv + shift, 0.0)


if __name__ == "__main__":
    # ConBnRelu(inp_dim=4, out_dim=8, kenel=3, stride=1, with_bn=True)
    N, CIN, H, W = 2, 4, 16, 16
    COUT, KERNEL, STRIDE = 8, 3, 1

    key = jax.random.PRNGKey(0)
    kx, kw, kg, kb, km, kv = jax.random.split(key, 6)

    x = jax.random.normal(kx, (N, CIN, H, W), dtype=jnp.float32)
    # Conv2d weight (Cout, Cin, kH, kW); bias=False because with_bn=True.
    conv_w = jax.random.normal(kw, (COUT, CIN, KERNEL, KERNEL), jnp.float32) * 0.1
    # BatchNorm2d params / running stats (eval-mode BN semantics).
    gamma = 1.0 + 0.1 * jax.random.normal(kg, (COUT,), jnp.float32)
    beta = 0.1 * jax.random.normal(kb, (COUT,), jnp.float32)
    run_mean = 0.1 * jax.random.normal(km, (COUT,), jnp.float32)
    run_var = 1.0 + 0.1 * jax.random.uniform(kv, (COUT,), jnp.float32)

    out = con_bn_relu_forward(x, conv_w, gamma, beta, run_mean, run_var,
                              kernel=KERNEL, stride=STRIDE)
    out = jax.block_until_ready(out)
    assert out.shape == (N, COUT, H, W), out.shape

    # Tight check against a reference computed at the kernel's operand precision.
    ref_q = _reference_bf16(x, conv_w, gamma, beta, run_mean, run_var, stride=STRIDE)
    assert jnp.allclose(out, ref_q, atol=1e-3, rtol=1e-3), float(
        jnp.max(jnp.abs(out - ref_q)))

    # Loose sanity check against the full-f32 reference (bf16 quantization error).
    ref = _reference_f32(x, conv_w, gamma, beta, run_mean, run_var, stride=STRIDE)
    assert jnp.allclose(out, ref, atol=5e-2, rtol=5e-2), float(
        jnp.max(jnp.abs(out - ref)))

    print("KERNEL_OK")
</pallas_src>

<mosaic_0001>
module attributes {stable_mosaic.version = 11 : i64} {
  func.func @_conv_bn_relu_kernel(%arg0: i32, %arg1: i32, %arg2: memref<1x328x4xbf16, #tpu.memory_space<vmem>>, %arg3: memref<9x4x128xbf16, #tpu.memory_space<vmem>>, %arg4: memref<1x128xf32, #tpu.memory_space<vmem>>, %arg5: memref<1x288x128xf32, #tpu.memory_space<vmem>>) attributes {dimension_semantics = [#tpu.dimension_semantics<parallel>, #tpu.dimension_semantics<parallel>], iteration_bounds = array<i64: 2, 1>, scalar_prefetch = 0 : i64, scratch_operands = 0 : i64, tpu.core_type = #tpu.core_type<tc>, window_params = [{transform_indices = @transform_0, window_bounds = array<i64: 1, 328, 4>}, {pipeline_mode = #tpu.pipeline_mode<synchronous>, transform_indices = @transform_1, window_bounds = array<i64: 9, 4, 128>}, {pipeline_mode = #tpu.pipeline_mode<synchronous>, transform_indices = @transform_2, window_bounds = array<i64: 1, 128>}, {transform_indices = @transform_3, window_bounds = array<i64: 1, 288, 128>}]} {
    %c288_i32 = arith.constant 288 : i32
    %0 = arith.muli %arg1, %c288_i32 : i32
    %1 = tpu.assume_multiple %0, 288 : i32
    %c0 = arith.constant 0 : index
    %2 = arith.index_cast %1 : i32 to index
    %c0_0 = arith.constant 0 : index
    %3 = vector.load %arg2[%c0, %2, %c0_0] : memref<1x328x4xbf16, #tpu.memory_space<vmem>>, vector<1x328x4xbf16>
    %4 = vector.shape_cast %3 : vector<1x328x4xbf16> to vector<328x4xbf16>
    %cst = arith.constant 0.000000e+00 : f32
    %5 = vector.broadcast %cst : f32 to vector<288x128xf32>
    %6 = vector.extract_strided_slice %4 {offsets = [0, 0], sizes = [288, 4], strides = [1, 1]} : vector<328x4xbf16> to vector<288x4xbf16>
    %c0_1 = arith.constant 0 : index
    %c0_2 = arith.constant 0 : index
    %c0_3 = arith.constant 0 : index
    %7 = vector.load %arg3[%c0_1, %c0_2, %c0_3] : memref<9x4x128xbf16, #tpu.memory_space<vmem>>, vector<1x4x128xbf16>
    %8 = vector.shape_cast %7 : vector<1x4x128xbf16> to vector<4x128xbf16>
    %cst_4 = arith.constant dense<0.000000e+00> : vector<288x128xf32>
    %9 = tpu.matmul %6, %8, %cst_4 {dimension_numbers = #tpu.dot_dimension_numbers<[1], [0], [0], [1], [0, 0, 1, 1], [], []>} : vector<288x4xbf16>, vector<4x128xbf16>, vector<288x128xf32> -> vector<288x128xf32>
    %10 = arith.addf %5, %9 : vector<288x128xf32>
    %11 = vector.extract_strided_slice %4 {offsets = [1, 0], sizes = [288, 4], strides = [1, 1]} : vector<328x4xbf16> to vector<288x4xbf16>
    %c1 = arith.constant 1 : index
    %c0_5 = arith.constant 0 : index
    %c0_6 = arith.constant 0 : index
    %12 = vector.load %arg3[%c1, %c0_5, %c0_6] : memref<9x4x128xbf16, #tpu.memory_space<vmem>>, vector<1x4x128xbf16>
    %13 = vector.shape_cast %12 : vector<1x4x128xbf16> to vector<4x128xbf16>
    %cst_7 = arith.constant dense<0.000000e+00> : vector<288x128xf32>
    %14 = tpu.matmul %11, %13, %cst_7 {dimension_numbers = #tpu.dot_dimension_numbers<[1], [0], [0], [1], [0, 0, 1, 1], [], []>} : vector<288x4xbf16>, vector<4x128xbf16>, vector<288x128xf32> -> vector<288x128xf32>
    %15 = arith.addf %10, %14 : vector<288x128xf32>
    %16 = vector.extract_strided_slice %4 {offsets = [2, 0], sizes = [288, 4], strides = [1, 1]} : vector<328x4xbf16> to vector<288x4xbf16>
    %c2 = arith.constant 2 : index
    %c0_8 = arith.constant 0 : index
    %c0_9 = arith.constant 0 : index
    %17 = vector.load %arg3[%c2, %c0_8, %c0_9] : memref<9x4x128xbf16, #tpu.memory_space<vmem>>, vector<1x4x128xbf16>
    %18 = vector.shape_cast %17 : vector<1x4x128xbf16> to vector<4x128xbf16>
    %cst_10 = arith.constant dense<0.000000e+00> : vector<288x128xf32>
    %19 = tpu.matmul %16, %18, %cst_10 {dimension_numbers = #tpu.dot_dimension_numbers<[1], [0], [0], [1], [0, 0, 1, 1], [], []>} : vector<288x4xbf16>, vector<4x128xbf16>, vector<288x128xf32> -> vector<288x128xf32>
    %20 = arith.addf %15, %19 : vector<288x128xf32>
    %21 = vector.extract_strided_slice %4 {offsets = [18, 0], sizes = [288, 4], strides = [1, 1]} : vector<328x4xbf16> to vector<288x4xbf16>
    %c3 = arith.constant 3 : index
    %c0_11 = arith.constant 0 : index
    %c0_12 = arith.constant 0 : index
    %22 = vector.load %arg3[%c3, %c0_11, %c0_12] : memref<9x4x128xbf16, #tpu.memory_space<vmem>>, vector<1x4x128xbf16>
    %23 = vector.shape_cast %22 : vector<1x4x128xbf16> to vector<4x128xbf16>
    %cst_13 = arith.constant dense<0.000000e+00> : vector<288x128xf32>
    %24 = tpu.matmul %21, %23, %cst_13 {dimension_numbers = #tpu.dot_dimension_numbers<[1], [0], [0], [1], [0, 0, 1, 1], [], []>} : vector<288x4xbf16>, vector<4x128xbf16>, vector<288x128xf32> -> vector<288x128xf32>
    %25 = arith.addf %20, %24 : vector<288x128xf32>
    %26 = vector.extract_strided_slice %4 {offsets = [19, 0], sizes = [288, 4], strides = [1, 1]} : vector<328x4xbf16> to vector<288x4xbf16>
    %c4 = arith.constant 4 : index
    %c0_14 = arith.constant 0 : index
    %c0_15 = arith.constant 0 : index
    %27 = vector.load %arg3[%c4, %c0_14, %c0_15] : memref<9x4x128xbf16, #tpu.memory_space<vmem>>, vector<1x4x128xbf16>
    %28 = vector.shape_cast %27 : vector<1x4x128xbf16> to vector<4x128xbf16>
    %cst_16 = arith.constant dense<0.000000e+00> : vector<288x128xf32>
    %29 = tpu.matmul %26, %28, %cst_16 {dimension_numbers = #tpu.dot_dimension_numbers<[1], [0], [0], [1], [0, 0, 1, 1], [], []>} : vector<288x4xbf16>, vector<4x128xbf16>, vector<288x128xf32> -> vector<288x128xf32>
    %30 = arith.addf %25, %29 : vector<288x128xf32>
    %31 = vector.extract_strided_slice %4 {offsets = [20, 0], sizes = [288, 4], strides = [1, 1]} : vector<328x4xbf16> to vector<288x4xbf16>
    %c5 = arith.constant 5 : index
    %c0_17 = arith.constant 0 : index
    %c0_18 = arith.constant 0 : index
    %32 = vector.load %arg3[%c5, %c0_17, %c0_18] : memref<9x4x128xbf16, #tpu.memory_space<vmem>>, vector<1x4x128xbf16>
    %33 = vector.shape_cast %32 : vector<1x4x128xbf16> to vector<4x128xbf16>
    %cst_19 = arith.constant dense<0.000000e+00> : vector<288x128xf32>
    %34 = tpu.matmul %31, %33, %cst_19 {dimension_numbers = #tpu.dot_dimension_numbers<[1], [0], [0], [1], [0, 0, 1, 1], [], []>} : vector<288x4xbf16>, vector<4x128xbf16>, vector<288x128xf32> -> vector<288x128xf32>
    %35 = arith.addf %30, %34 : vector<288x128xf32>
    %36 = vector.extract_strided_slice %4 {offsets = [36, 0], sizes = [288, 4], strides = [1, 1]} : vector<328x4xbf16> to vector<288x4xbf16>
    %c6 = arith.constant 6 : index
    %c0_20 = arith.constant 0 : index
    %c0_21 = arith.constant 0 : index
    %37 = vector.load %arg3[%c6, %c0_20, %c0_21] : memref<9x4x128xbf16, #tpu.memory_space<vmem>>, vector<1x4x128xbf16>
    %38 = vector.shape_cast %37 : vector<1x4x128xbf16> to vector<4x128xbf16>
    %cst_22 = arith.constant dense<0.000000e+00> : vector<288x128xf32>
    %39 = tpu.matmul %36, %38, %cst_22 {dimension_numbers = #tpu.dot_dimension_numbers<[1], [0], [0], [1], [0, 0, 1, 1], [], []>} : vector<288x4xbf16>, vector<4x128xbf16>, vector<288x128xf32> -> vector<288x128xf32>
    %40 = arith.addf %35, %39 : vector<288x128xf32>
    %41 = vector.extract_strided_slice %4 {offsets = [37, 0], sizes = [288, 4], strides = [1, 1]} : vector<328x4xbf16> to vector<288x4xbf16>
    %c7 = arith.constant 7 : index
    %c0_23 = arith.constant 0 : index
    %c0_24 = arith.constant 0 : index
    %42 = vector.load %arg3[%c7, %c0_23, %c0_24] : memref<9x4x128xbf16, #tpu.memory_space<vmem>>, vector<1x4x128xbf16>
    %43 = vector.shape_cast %42 : vector<1x4x128xbf16> to vector<4x128xbf16>
    %cst_25 = arith.constant dense<0.000000e+00> : vector<288x128xf32>
    %44 = tpu.matmul %41, %43, %cst_25 {dimension_numbers = #tpu.dot_dimension_numbers<[1], [0], [0], [1], [0, 0, 1, 1], [], []>} : vector<288x4xbf16>, vector<4x128xbf16>, vector<288x128xf32> -> vector<288x128xf32>
    %45 = arith.addf %40, %44 : vector<288x128xf32>
    %46 = vector.extract_strided_slice %4 {offsets = [38, 0], sizes = [288, 4], strides = [1, 1]} : vector<328x4xbf16> to vector<288x4xbf16>
    %c8 = arith.constant 8 : index
    %c0_26 = arith.constant 0 : index
    %c0_27 = arith.constant 0 : index
    %47 = vector.load %arg3[%c8, %c0_26, %c0_27] : memref<9x4x128xbf16, #tpu.memory_space<vmem>>, vector<1x4x128xbf16>
    %48 = vector.shape_cast %47 : vector<1x4x128xbf16> to vector<4x128xbf16>
    %cst_28 = arith.constant dense<0.000000e+00> : vector<288x128xf32>
    %49 = tpu.matmul %46, %48, %cst_28 {dimension_numbers = #tpu.dot_dimension_numbers<[1], [0], [0], [1], [0, 0, 1, 1], [], []>} : vector<288x4xbf16>, vector<4x128xbf16>, vector<288x128xf32> -> vector<288x128xf32>
    %50 = arith.addf %45, %49 : vector<288x128xf32>
    %c0_29 = arith.constant 0 : index
    %c0_30 = arith.constant 0 : index
    %51 = vector.load %arg4[%c0_29, %c0_30] : memref<1x128xf32, #tpu.memory_space<vmem>>, vector<1x128xf32>
    %52 = vector.broadcast %51 : vector<1x128xf32> to vector<288x128xf32>
    %53 = arith.addf %50, %52 : vector<288x128xf32>
    %cst_31 = arith.constant 0.000000e+00 : f32
    %54 = vector.broadcast %cst_31 : f32 to vector<288x128xf32>
    %55 = arith.maximumf %53, %54 : vector<288x128xf32>
    %c0_32 = arith.constant 0 : index
    %c0_33 = arith.constant 0 : index
    %c0_34 = arith.constant 0 : index
    %56 = vector.load %arg5[%c0_32, %c0_33, %c0_34] : memref<1x288x128xf32, #tpu.memory_space<vmem>>, vector<1x288x128xf32>
    %57 = vector.shape_cast %56 : vector<1x288x128xf32> to vector<288x128xf32>
    %58 = vector.shape_cast %55 : vector<288x128xf32> to vector<1x288x128xf32>
    tpu.vector_store %arg5[%c0_32, %c0_33, %c0_34], %58 {strides = array<i32>} : memref<1x288x128xf32, #tpu.memory_space<vmem>>, vector<1x288x128xf32>,
    return
  }
  func.func @transform_0(%arg0: i32, %arg1: i32) -> (i32, i32, i32) {
    %c0_i32 = arith.constant 0 : i32
    %c0_i32_0 = arith.constant 0 : i32
    %c0_i32_1 = arith.constant 0 : i32
    return %arg0, %c0_i32, %c0_i32_0 : i32, i32, i32
  }
  func.func @transform_1(%arg0: i32, %arg1: i32) -> (i32, i32, i32) {
    %c0_i32 = arith.constant 0 : i32
    %c0_i32_0 = arith.constant 0 : i32
    %c0_i32_1 = arith.constant 0 : i32
    %c0_i32_2 = arith.constant 0 : i32
    return %c0_i32, %c0_i32_0, %c0_i32_1 : i32, i32, i32
  }
  func.func @transform_2(%arg0: i32, %arg1: i32) -> (i32, i32) {
    %c0_i32 = arith.constant 0 : i32
    %c0_i32_0 = arith.constant 0 : i32
    %c0_i32_1 = arith.constant 0 : i32
    return %c0_i32, %c0_i32_0 : i32, i32
  }
  func.func @transform_3(%arg0: i32, %arg1: i32) -> (i32, i32, i32) {
    %c0_i32 = arith.constant 0 : i32
    %c0_i32_0 = arith.constant 0 : i32
    return %arg0, %arg1, %c0_i32 : i32, i32, i32
  }
}

</mosaic_0001>

<bundles_post_ra>
// kernel: con_bn_relu_forward.1
= control target key start
LH: loop header
LB: loop body
LE: loop exit
PB: predicated region body
PF: predicated region fallthrough
CT: control target
= control target key end

     0   :  { %s4359_s12 = smov 0   ;;  %s4361_s13 = smov 0   ;;  %s5400_s0 = inlined_call_operand.vmem [shape: bf16[2,328,4], index: 0, kind: input, shape index: {}]   ;;  %s5401_s1 = inlined_call_operand.vmem [shape: bf16[9,4,128], index: 1, kind: input, shape index: {}]   ;;  %s5402_s2 = inlined_call_operand.vmem [shape: f32[1,128], index: 2, kind: input, shape index: {}]   ;;  %s5403_s3 = inlined_call_operand.vmem [shape: f32[2,288,128], index: 3, kind: output, shape index: {}]  }
   0x1   :  { %s4363_s14 = smov 0  }
   0x2 LB: > { %s25_s15 = sadd.s32 1, %s4333_s13  ;;  %p3254_p0 = scmp.ge.s32.totalorder %s4337_s14, 1  ;;  %s4337_s14 = sphi %s4363_s14, %s13_s14   ;;  %s4333_s13 = sphi %s4361_s13, %s5472_s13   ;;  %s4329_s12 = sphi %s4359_s12, %s5471_s12  }
   0x3   : > { %p27_p1 = scmp.ge.s32.totalorder %s25_s15, 2  ;;  %p151_p2 = scmp.lt.s32.totalorder %s4337_s14, 3 }
   0x5   : > { %s5474_s15 = smov (%p27_p1, %s25_s15), 0  ;;  %p152_p3 = pnand %p3254_p0, %p151_p2 }
   0x7   : > { %155 = sbr.rel (%p152_p3) target bundleno = 573 (0x23d), region = 32 }
   0xe   : > { %vm541_vm0 = vcmask 1041408   ;;  %v4380_v0 = vld [vmem:[%s5401_s1 + $0x8] sm:$0x3]  ;;  %v3257_v1 = vld [vmem:[%s5401_s1 + $0x2] sm:$0x3]  ;;  %p179_p4 = scmp.lt.s32.totalorder %s4329_s12, 1 }
   0xf   : > { %4260 = vmatprep.subr.msk.bf16.mxu0 %vm541_vm0, %v4380_v0  ;;  %4256 = vmatprep.subr.msk.bf16.mxu1 %vm541_vm0, %v3257_v1  ;;  %v4390_v2 = vsel %vm541_vm0, %v4380_v0, 0  ;;  %v543_v3 = vsel %vm541_vm0, %v3257_v1, 0  ;;  %v3372_v4 = vld [vmem:[%s5401_s1 + $0xa] sm:$0x3]  ;;  %v241_v5 = vld [vmem:[%s5401_s1] sm:$0x3] }
  0x10   : > { %5435 = vst [vmem:[#allocation2_spill] sm:$0xff] %v4390_v2  ;;  %3777 = vmatpush3.bf16.msra.mxu0 %v4390_v2  ;;  %3625 = vmatpush3.bf16.msra.mxu1 %v543_v3  ;;  %s5476_s12 = smov (!%p179_p4, %s4329_s12), 1  ;;  %vm337_vm1 = vsmask.f32 7424  ;;  %vm1484_vm2 = vsmask.f32 6400 }
  0x11   : > { %4262 = vmatprep.subr.msk.bf16.mxu0 %vm541_vm0, %v3372_v4  ;;  %s4266_s24 = smul.u32 164, %s5476_s12  ;;  %4257 = vmatprep.subr.msk.bf16.mxu1 %vm541_vm0, %v241_v5  ;;  %vm486_vm3 = vcmask 31744   ;;  %v1935_v8 = vsel %vm541_vm0, %v3372_v4, 0  ;;  %v759_v10 = vsel %vm541_vm0, %v241_v5, 0  ;;  %v4455_v36 = vld [vmem:[%s5401_s1 + $0x4] sm:$0x3] }
  0x12   : > { %v4486_v51 = vld [vmem:[%s5401_s1 + $0xc] sm:$0x3]  ;;  %vm1842_vm4 = vcmask 1045504   ;;  %vm2386_vm5 = vsmask.f32 5376  ;;  %vm940_vm6 = vcmask 1046528  }
  0x13   : > { %s4408_s27 = scalar_lea.vmem %s5400_s0, %s4266_s24  ;;  %vm2744_vm7 = vcmask 1044480   ;;  %s4267_s11 = smul.u32 288, %s5476_s12 }
  0x14   : > { %v4411_v6 = vld [vmem:[%s4408_s27] sm:$0xff]   ;;  %v4414_v7 = vld [vmem:[%s4408_s27 + $0x8] sm:$0xff]   ;;  %v4418_v9 = vld [vmem:[%s4408_s27 + $0x10] sm:$0xff]  }
  0x15   : > { %v339_v11 = vshrl.u32 %v4411_v6, 16  ;;  %v341_v12 = vshll.u32 %v4411_v6, 16  ;;  %v346_v13 = vshll.u32 %v4414_v7, 16  ;;  %v350_v14 = vshrl.u32 %v4414_v7, 16  ;;  %v4432_v17 = vld [vmem:[%s4408_s27 + $0x18] sm:$0xff]   ;;  %v4435_v18 = vld [vmem:[%s4408_s27 + $0x20] sm:$0xff]   ;;  %s5310_s20 = scalar_lea.vmem %s5403_s3, %s4267_s11 }
  0x16   : > { %v4426_v15 = vshll.u32 %v4418_v9, 16  ;;  %v4429_v16 = vshrl.u32 %v4418_v9, 16  ;;  %v4441_v26 = vshll.u32 %v4432_v17, 16  ;;  %v4444_v30 = vshrl.u32 %v4432_v17, 16  ;;  %v4447_v31 = vld [vmem:[%s4408_s27 + $0x28] sm:$0xff]   ;;  %v4464_v41 = vld [vmem:[%s4408_s27 + $0x30] sm:$0xff]  }
  0x17   : > { %v343_v19 = vrot.slane %v341_v12, 1  ;;  %v348_v20 = vrot.slane %v346_v13, 1  ;;  %v1485_v21 = vrot.slane %v350_v14, 1  ;;  %v1486_v22 = vrot.slane %v346_v13, 2  ;;  %v4481_v50 = vld [vmem:[%s4408_s27 + $0x38] sm:$0xff]   ;;  %v4509_v63 = vld [vmem:[%s4408_s27 + $0x40] sm:$0xff]  }
  0x18   : > { %v1488_v23 = vrot.slane %v4429_v16, 1  ;;  %v1489_v24 = vrot.slane %v4426_v15, 2  ;;  %v356_v25 = vrot.slane %v4426_v15, 1  ;;  %v1493_v33 = vrot.slane %v4441_v26, 2 }
  0x19   : > { %v344_v27 = vor.u32 %v343_v19, %v339_v11  ;;  %v352_v28 = vor.u32 %v350_v14, %v348_v20  ;;  %v1487_v29 = vor.u32 %v1486_v22, %v1485_v21  ;;  %v364_v35 = vrot.slane %v4441_v26, 1 }
  0x1a   : > { %v1490_v32 = vor.u32 %v1489_v24, %v1488_v23  ;;  %v360_v34 = vor.u32 %v4429_v16, %v356_v25  ;;  %v1492_v39 = vrot.slane %v4444_v30, 1  ;;  %v4461_v40 = vshll.u32 %v4435_v18, 16  ;;  %v4536_v23 = vld [vmem:[%s4408_s27 + $0x48] sm:$0xff]  }
  0x1b   : > { %v349_v37 = vsel %vm337_vm1, %v344_v27, %v348_v20  ;;  %v357_v38 = vsel %vm337_vm1, %v352_v28, %v356_v25  ;;  %v4470_v44 = vshrl.u32 %v4435_v18, 16  ;;  %v368_v45 = vor.u32 %v4444_v30, %v364_v35  ;;  %v4543_v28 = vld [vmem:[%s4408_s27 + $0x50] sm:$0xff]  }
  0x1c   : > { %3626 = vmatprep.mubr.msk.bf16.mxu1 %vm486_vm3, %v349_v37  ;;  %v1491_v42 = vsel %vm1484_vm2, %v1487_v29, %v1490_v32  ;;  %v365_v43 = vsel %vm337_vm1, %v360_v34, %v364_v35  ;;  %v1494_v46 = vor.u32 %v1493_v33, %v1492_v39  ;;  %v1497_v47 = vrot.slane %v4461_v40, 2 }
  0x1d   : > { %3778 = vmatprep.mubr.msk.bf16.mxu0 %vm486_vm3, %v1491_v42  ;;  %3627 = vmatmul.mubr.msk.bf16.vlgmr.msra.gmra.mrb[0].mxu1 %vm486_vm3, %v357_v38  ;;  %v372_v48 = vrot.slane %v4461_v40, 1  ;;  %v4478_v49 = vshll.u32 %v4447_v31, 16  ;;  %v1496_v52 = vrot.slane %v4470_v44, 1  ;;  %v4491_v53 = vshrl.u32 %v4447_v31, 16 }
  0x1e   : > { %3630 = vmatprep.mubr.msk.bf16.mxu1 %vm486_vm3, %v365_v43  ;;  %3663 = vmatpush3.bf16.msra.mxu1 %v759_v10  ;;  %v4494_v54 = vshll.u32 %v4464_v41, 16  ;;  %v4497_v55 = vshrl.u32 %v4464_v41, 16  ;;  %v1495_v56 = vsel %vm1484_vm2, %v1490_v32, %v1494_v46  ;;  %v4513_v3 = vshll.u32 %v4481_v50, 16 }
  0x1f   : > { %v1501_v57 = vrot.slane %v4478_v49, 2  ;;  %v376_v58 = vor.u32 %v4470_v44, %v372_v48  ;;  %4258 = vmatprep.subr.msk.bf16.mxu1 %vm541_vm0, %v4455_v36  ;;  %3779 = vmatmul.mubr.msk.bf16.vlgmr.msra.gmra.mrb[0].mxu0 %vm486_vm3, %v1495_v56  ;;  %v1498_v59 = vor.u32 %v1497_v47, %v1496_v52  ;;  %v1500_v60 = vrot.slane %v4491_v53, 1  ;;  %v4570_v56 = vld [vmem:[%s4408_s27 + $0x58] sm:$0xff]  }
  0x20   : > { %v380_v61 = vrot.slane %v4478_v49, 1  ;;  %v1504_v62 = vrot.slane %v4497_v55, 1  ;;  %3815 = vmatpush3.bf16.msra.mxu0 %v1935_v8  ;;  %v1505_v1 = vrot.slane %v4494_v54, 2  ;;  %v4516_v4 = vshrl.u32 %v4481_v50, 16 }
  0x21   : > { %v1499_v5 = vsel %vm1484_vm2, %v1494_v46, %v1498_v59  ;;  %v373_v10 = vsel %vm337_vm1, %v368_v45, %v372_v48  ;;  %v1502_v11 = vor.u32 %v1501_v57, %v1500_v60  ;;  %4263 = vmatprep.subr.msk.bf16.mxu0 %vm541_vm0, %v4486_v51  ;;  %v388_v13 = vrot.slane %v4494_v54, 1 }
  0x22   : > { %3782 = vmatprep.mubr.msk.bf16.mxu0 %vm486_vm3, %v1499_v5  ;;  %v381_v8 = vsel %vm337_vm1, %v376_v58, %v380_v61  ;;  %v1506_v12 = vor.u32 %v1505_v1, %v1504_v62  ;;  %v4526_v14 = vshll.u32 %v4509_v63, 16  ;;  %v1508_v20 = vrot.slane %v4516_v4, 1 }
  0x23   : > { %v1503_v19 = vsel %vm1484_vm2, %v1498_v59, %v1502_v11  ;;  %v1509_v21 = vrot.slane %v4513_v3, 2  ;;  %v4533_v22 = vshrl.u32 %v4509_v63, 16  ;;  %v384_v25 = vor.u32 %v4491_v53, %v380_v61 }
  0x24   : > { %v1507_v24 = vsel %vm1484_vm2, %v1502_v11, %v1506_v12  ;;  %v1513_v27 = vrot.slane %v4526_v14, 2  ;;  %v392_v29 = vor.u32 %v4497_v55, %v388_v13  ;;  %v396_v32 = vrot.slane %v4513_v3, 1 }
  0x25   : > { %3631 = vmatmul.mubr.msk.bf16.gmra.mrb[4].mxu1 %vm486_vm3, %v373_v10  ;;  %v1512_v33 = vrot.slane %v4533_v22, 1  ;;  %v1510_v34 = vor.u32 %v1509_v21, %v1508_v20  ;;  %v4551_v35 = vshll.u32 %v4536_v23, 16  ;;  %v4554_v37 = vshrl.u32 %v4536_v23, 16 }
  0x26   : > { %3634 = vmatprep.mubr.msk.bf16.mxu1 %vm486_vm3, %v381_v8  ;;  %v389_v38 = vsel %vm337_vm1, %v384_v25, %v388_v13  ;;  %v4558_v42 = vshll.u32 %v4543_v28, 16  ;;  %v4561_v43 = vshrl.u32 %v4543_v28, 16  ;;  %v397_v45 = vsel %vm337_vm1, %v392_v29, %v396_v32  ;;  %v4590_v13 = vld [vmem:[%s4408_s27 + $0x88] sm:$0xff]   ;;  %v4598_v25 = vld [vmem:[%s4408_s27 + $0x60] sm:$0xff]  }
  0x27   : > { %3783 = vmatmul.mubr.msk.bf16.gmra.mrb[4].mxu0 %vm486_vm3, %v1503_v19  ;;  %v1514_v39 = vor.u32 %v1513_v27, %v1512_v33  ;;  %v1511_v46 = vsel %vm1484_vm2, %v1506_v12, %v1510_v34  ;;  %v404_v47 = vrot.slane %v4526_v14, 1  ;;  %v1516_v48 = vrot.slane %v4554_v37, 1  ;;  %v236_v27 = vld [vmem:[%s4408_s27 + $0x90] sm:$0xf] }
  0x28   : > { %3786 = vmatprep.mubr.msk.bf16.mxu0 %vm486_vm3, %v1507_v24  ;;  %v1517_v52 = vrot.slane %v4551_v35, 2  ;;  %v400_v58 = vor.u32 %v4516_v4, %v396_v32  ;;  %v1520_v59 = vrot.slane %v4561_v43, 1  ;;  %v1521_v60 = vrot.slane %v4558_v42, 2 }
  0x29   : > { %v1515_v57 = vsel %vm1484_vm2, %v1510_v34, %v1514_v39  ;;  %v408_v61 = vor.u32 %v4533_v22, %v404_v47  ;;  %v412_v62 = vrot.slane %v4551_v35, 1  ;;  %v4582_v5 = vshll.u32 %v4570_v56, 16 }
  0x2a   : > { %v1518_v1 = vor.u32 %v1517_v52, %v1516_v48  ;;  %v4585_v10 = vshrl.u32 %v4570_v56, 16  ;;  %v405_v11 = vsel %vm337_vm1, %v400_v58, %v404_v47  ;;  %v1522_v8 = vor.u32 %v1521_v60, %v1520_v59 }
  0x2b   : > { %5436 = vst [vmem:[#allocation3_spill] sm:$0xff] %v4582_v5  ;;  %v413_v12 = vsel %vm337_vm1, %v408_v61, %v412_v62  ;;  %v420_v20 = vrot.slane %v4558_v42, 1  ;;  %v1525_v24 = vrot.slane %v4582_v5, 2  ;;  %v416_v32 = vor.u32 %v4554_v37, %v412_v62 }
  0x2c   : > { %5437 = vst [vmem:[#allocation4_spill] sm:$0xff] %v4585_v10  ;;  %v1519_v19 = vsel %vm1484_vm2, %v1514_v39, %v1518_v1  ;;  %v1524_v21 = vrot.slane %v4585_v10, 1  ;;  %v1523_v29 = vsel %vm1484_vm2, %v1518_v1, %v1522_v8  ;;  %v428_v34 = vrot.slane %v4582_v5, 1 }
  0x2d   : > { %3635 = vmatmul.mubr.msk.bf16.gmra.mrb[8].mxu1 %vm486_vm3, %v389_v38  ;;  %v424_v33 = vor.u32 %v4561_v43, %v420_v20  ;;  %v4607_v38 = vld [vmem:[%s4408_s27 + $0x68] sm:$0xff]   ;;  %v4610_v39 = vshll.u32 %v4590_v13, 16  ;;  %v4622_v48 = vshll.u32 %v4598_v25, 16  ;;  %v1843_v58 = vrot.slane %v4414_v7, 2 }
  0x2e   : > { %3638 = vmatprep.mubr.msk.bf16.mxu1 %vm486_vm3, %v397_v45  ;;  %v4613_v45 = vcombine.low %v236_v27, %v236_v27  ;;  %v4619_v47 = vor.u32 %v1525_v24, %v1524_v21  ;;  %v1844_v59 = vrot.slane %v4418_v9, 2  ;;  %v4631_v62 = vshrl.u32 %v4598_v25, 16  ;;  %v4644_v21 = vld [vmem:[%s4408_s27 + $0x70] sm:$0xff]  }
  0x2f   : > { %3787 = vmatmul.mubr.msk.bf16.gmra.mrb[8].mxu0 %vm486_vm3, %v1511_v46  ;;  %v4616_v46 = vshrl.u32 %v4590_v13, 16  ;;  %5441 = vst [vmem:[#allocation8_spill] sm:$0xff] %v4622_v48  ;;  %v5404_v52 = vrot.slane %v4610_v39, 1  ;;  %v429_v61 = vsel %vm337_vm1, %v424_v33, %v428_v34  ;;  %v4634_v1 = vshll.u32 %v4607_v38, 16 }
  0x30   : > { %3790 = vmatprep.mubr.msk.bf16.mxu0 %vm486_vm3, %v1515_v57  ;;  %5438 = vst [vmem:[#allocation5_spill] sm:$0xff] %v4613_v45  ;;  %5440 = vst [vmem:[#allocation7_spill] sm:$0xff] %v4619_v47  ;;  %v421_v57 = vsel %vm337_vm1, %v416_v32, %v420_v20  ;;  %v482_v60 = vshll.u32 %v4613_v45, 16  ;;  %v436_v20 = vrot.slane %v4622_v48, 1  ;;  %v1845_v24 = vsel %vm1842_vm4, %v1843_v58, %v1844_v59 }
  0x31   : > { %5439 = vst [vmem:[#allocation6_spill] sm:$0xff] %v4616_v46  ;;  %5442 = vst [vmem:[#allocation9_spill] sm:$0xff] %v4631_v62  ;;  %v4661_v58 = vshll.u32 %v4644_v21, 16  ;;  %v5452_v5 = vrot.slane %v4610_v39, 1  ;;  %v2395_v45 = vrot.slane %v4461_v40, 3  ;;  %v1858_v40 = vrot.slane %v4536_v23, 2 }
  0x32   : > { %5443 = vst [vmem:[#allocation10_spill] sm:$0xff] %v4634_v1  ;;  %v440_v33 = vor.u32 %v4631_v62, %v436_v20 }
  0x33   : > { %5444 = vst [vmem:[#allocation11_spill] sm:$0xff] %v4661_v58 }
  0x35   : > { %3639 = vmatmul.mubr.msk.bf16.gmra.mrb[12].mxu1 %vm486_vm3, %v405_v11  ;;  %v480_v11 = vor.u32 %v4616_v46, %v5404_v52  ;;  %v4670_v52 = vshrl.u32 %v4644_v21, 16 }
  0x36   : > { %3642 = vmatprep.mubr.msk.bf16.mxu1 %vm486_vm3, %v413_v12  ;;  %v484_v12 = vrot.slane %v482_v60, 1  ;;  %v1846_v60 = vrot.slane %v4432_v17, 2 }
  0x37   : > { %3791 = vmatmul.mubr.msk.bf16.gmra.mrb[12].mxu0 %vm486_vm3, %v1519_v19  ;;  %v1527_v19 = vsel %vm1484_vm2, %v1522_v8, %v4619_v47  ;;  %v4655_v8 = vld [vmem:[%s4408_s27 + $0x78] sm:$0xff]   ;;  %5446 = vst [vmem:[#allocation13_spill] sm:$0xff] %v4670_v52  ;;  %v4682_v47 = vld [vmem:[%s4408_s27 + $0x80] sm:$0xff]  }
  0x38   : > { %3794 = vmatprep.mubr.msk.bf16.mxu0 %vm486_vm3, %v1523_v29  ;;  %v432_v29 = vor.u32 %v4585_v10, %v428_v34  ;;  %v4650_v32 = vsel %vm337_vm1, %v480_v11, %v484_v12  ;;  %v4666_v11 = vshrl.u32 %v4607_v38, 16  ;;  %v2394_v10 = vrot.slane %v4470_v44, 2 }
  0x39   : > { %v2398_v44 = vrot.slane %v4491_v53, 2 }
  0x3a   : > { %v437_v34 = vsel %vm337_vm1, %v432_v29, %v436_v20  ;;  %5445 = vst [vmem:[#allocation12_spill] sm:$0xff] %v4666_v11  ;;  %v4678_v20 = vsel %vm1842_vm4, %v1844_v59, %v1846_v60  ;;  %v452_v29 = vrot.slane %v4661_v58, 1  ;;  %v4698_v58 = vld [vmem:[%s5401_s1 + $0xe] sm:$0x3] }
  0x3d   : > { %3643 = vmatmul.mubr.msk.bf16.gmra.mrb[16].mxu1 %vm486_vm3, %v421_v57  ;;  %v444_v57 = vrot.slane %v4634_v1, 1  ;;  %v456_v1 = vor.u32 %v4670_v52, %v452_v29  ;;  %v4718_v52 = vshrl.u32 %v4655_v8, 16 }
  0x3e   : > { %3646 = vmatprep.mubr.msk.bf16.mxu1 %vm486_vm3, %v429_v61  ;;  %v1848_v61 = vrot.slane %v4435_v18, 2 }
  0x3f   : > { %3795 = vmatmul.mubr.msk.bf16.gmra.mrb[16].mxu0 %vm486_vm3, %v1527_v19  ;;  %v445_v12 = vsel %vm337_vm1, %v440_v33, %v444_v57  ;;  %v4673_v19 = vshll.u32 %v4655_v8, 16  ;;  %v2169_v33 = vsel %vm541_vm0, %v4486_v51, 0  ;;  %v448_v2 = vor.u32 %v4666_v11, %v444_v57  ;;  %v4703_v51 = vld [vmem:[%s4408_s27 + $0x98] sm:$0xf]  ;;  %5450 = vst [vmem:[#allocation17_spill] sm:$0xff] %v4718_v52 }
  0x40   : > { %3816 = vmatprep.mubr.msk.bf16.mxu0 %vm486_vm3, %v1845_v24  ;;  %v237_v24 = vld [vmem:[%s4408_s27 + $0x94] sm:$0xf]  ;;  %v4688_v46 = vsel %vm1842_vm4, %v1846_v60, %v1848_v61  ;;  %v239_v60 = vld [vmem:[%s4408_s27 + $0x9c] sm:$0xf]  ;;  %v1850_v57 = vrot.slane %v4447_v31, 2  ;;  %v4724_v11 = vshrl.u32 %v4682_v47, 16 }
  0x41   : > { %5447 = vst [vmem:[#allocation14_spill] sm:$0xff] %v4673_v19  ;;  %v4693_v59 = vcombine.low %v236_v27, %v237_v24  ;;  %v4710_v27 = vshll.u32 %v4682_v47, 16  ;;  %v453_v24 = vsel %vm337_vm1, %v448_v2, %v452_v29 }
  0x42   : > { %5451 = vst [vmem:[#allocation18_spill] sm:$0xff] %v4724_v11  ;;  %v4732_v2 = vsel %vm1842_vm4, %v1848_v61, %v1850_v57  ;;  %v2387_v61 = vrot.slane %v4429_v16, 2 }
  0x43   : > { %5448 = vst [vmem:[#allocation15_spill] sm:$0xff] %v4693_v59  ;;  %5449 = vst [vmem:[#allocation16_spill] sm:$0xff] %v4710_v27  ;;  %v4727_v48 = vrot.slane %v4693_v59, 2  ;;  %v468_v29 = vrot.slane %v4710_v27, 1  ;;  %v2388_v27 = vrot.slane %v4426_v15, 3 }
  0x45   : > { %3647 = vmatmul.mubr.msk.bf16.gmra.mrb[20].mxu1 %vm486_vm3, %v437_v34  ;;  %v460_v34 = vrot.slane %v4673_v19, 1  ;;  %v1852_v19 = vrot.slane %v4464_v41, 2 }
  0x46   : > { %3650 = vmatprep.mubr.msk.bf16.mxu1 %vm486_vm3, %v445_v12  ;;  %v4713_v12 = vcombine.low %v4703_v51, %v239_v60 }
  0x47   : > { %3817 = vmatmul.mubr.msk.bf16.vlgmr.msra.gmra.mrb[0].mxu0 %vm486_vm3, %v4678_v20  ;;  %v4743_v59 = vsel %vm1842_vm4, %v1850_v57, %v1852_v19  ;;  %v464_v62 = vor.u32 %v4718_v52, %v460_v34  ;;  %v2391_v57 = vrot.slane %v4441_v26, 3  ;;  %v2389_v52 = vor.u32 %v2388_v27, %v2387_v61 }
  0x48   : > { %3853 = vmatpush3.bf16.msra.mxu0 %v2169_v33  ;;  %3820 = vmatprep.mubr.msk.bf16.mxu0 %vm486_vm3, %v4688_v46  ;;  %v461_v33 = vsel %vm337_vm1, %v456_v1, %v460_v34  ;;  %v5427_v60 = vrot.slane %v4713_v12, 2  ;;  %v1864_v61 = vrot.slane %v4598_v25, 2 }
  0x49   : > { %4264 = vmatprep.subr.msk.bf16.mxu0 %vm541_vm0, %v4698_v58  ;;  %v469_v34 = vsel %vm337_vm1, %v464_v62, %v468_v29  ;;  %v2396_v62 = vor.u32 %v2395_v45, %v2394_v10  ;;  %v2399_v10 = vrot.slane %v4478_v49, 3  ;;  %v1860_v45 = vrot.slane %v4543_v28, 2 }
  0x4a   : > { %v4739_v1 = vsel %vm1842_vm4, %v4727_v48, %v5427_v60  ;;  %v1854_v60 = vrot.slane %v4481_v50, 2 }
  0x4b   : > { %v4798_v49 = vsel %vm1842_vm4, %v1858_v40, %v1860_v45 }
  0x4d   : > { %3651 = vmatmul.mubr.msk.bf16.gmra.mrb[24].mxu1 %vm486_vm3, %v453_v24  ;;  %v472_v24 = vor.u32 %v4724_v11, %v468_v29  ;;  %v1856_v11 = vrot.slane %v4509_v63, 2 }
  0x4e   : > { %3654 = vmatprep.mubr.msk.bf16.mxu1 %vm486_vm3, %v461_v33  ;;  %v2390_v33 = vrot.slane %v4444_v30, 2  ;;  %v4765_v30 = vsel %vm1842_vm4, %v1852_v19, %v1854_v60  ;;  %v2402_v19 = vrot.slane %v4497_v55, 2  ;;  %v2406_v55 = vrot.slane %v4516_v4, 2  ;;  %v4818_v4 = vld [vmem:[%s5401_s1 + $0x6] sm:$0x3] }
  0x4f   : > { %3821 = vmatmul.mubr.msk.bf16.gmra.mrb[4].mxu0 %vm486_vm3, %v4732_v2  ;;  %v477_v16 = vsel %vm337_vm1, %v472_v24, %v5452_v5  ;;  %v4772_v27 = vsel %vm1842_vm4, %v1854_v60, %v1856_v11  ;;  %v2403_v60 = vrot.slane %v4494_v54, 3  ;;  %v4790_v29 = vsel %vm1842_vm4, %v1856_v11, %v1858_v40 }
  0x50   : > { %3824 = vmatprep.mubr.msk.bf16.mxu0 %vm486_vm3, %v4743_v59  ;;  %v2392_v15 = vor.u32 %v2391_v57, %v2390_v33  ;;  %v1862_v11 = vrot.slane %v4570_v56, 2  ;;  %v1033_v57 = vsel %vm541_vm0, %v4455_v36, 0  ;;  %v2415_v40 = vrot.slane %v4551_v35, 3 }
  0x51   : > { %v2404_v53 = vor.u32 %v2403_v60, %v2402_v19  ;;  %v2419_v19 = vrot.slane %v4558_v42, 3 }
  0x52   : > { %v4768_v26 = vsel %vm2386_vm5, %v2389_v52, %v2392_v15  ;;  %v4775_v5 = vsel %vm2386_vm5, %v2392_v15, %v2396_v62  ;;  %v2400_v52 = vor.u32 %v2399_v10, %v2398_v44  ;;  %v4826_v15 = vsel %vm1842_vm4, %v1860_v45, %v1862_v11 }
  0x53   : > { %v4831_v36 = vsel %vm1842_vm4, %v1862_v11, %v1864_v61  ;;  %v1866_v44 = vrot.slane %v4607_v38, 2  ;;  %v1868_v10 = vrot.slane %v4644_v21, 2 }
  0x54   : > { %v4793_v24 = vsel %vm2386_vm5, %v2396_v62, %v2400_v52  ;;  %v4803_v54 = vsel %vm2386_vm5, %v2400_v52, %v2404_v53  ;;  %v2418_v52 = vrot.slane %v4561_v43, 2  ;;  %v1870_v43 = vrot.slane %v4655_v8, 2 }
  0x55   : > { %3655 = vmatmul.mubr.msk.bf16.gmra.mrb[28].mxu1 %vm486_vm3, %v469_v34  ;;  %v2410_v34 = vrot.slane %v4533_v22, 2  ;;  %v2414_v22 = vrot.slane %v4554_v37, 2  ;;  %v4854_v35 = vsel %vm1842_vm4, %v1864_v61, %v1866_v44  ;;  %v1874_v61 = vrot.slane %v4590_v13, 2 }
  0x56   : > { %3658 = vmatprep.mubr.msk.bf16.mxu1 %vm486_vm3, %v477_v16  ;;  %v2411_v16 = vrot.slane %v4526_v14, 3  ;;  %v4856_v37 = vor.u32 %v2419_v19, %v2418_v52  ;;  %v5023_v52 = vld [vmem:[%s4408_s27 + $0xa0] ss:$0 sps:$4 sm:$0xff]   ;;  %v960_v19 = vrot.slane %v4543_v28, 1 }
  0x57   : > { %3825 = vmatmul.mubr.msk.bf16.gmra.mrb[8].mxu0 %vm486_vm3, %v4765_v30  ;;  %v2416_v45 = vor.u32 %v2415_v40, %v2414_v22  ;;  %v956_v40 = vrot.slane %v4509_v63, 1 }
  0x58   : > { %3828 = vmatprep.mubr.msk.bf16.mxu0 %vm486_vm3, %v4772_v27  ;;  %v2412_v62 = vor.u32 %v2411_v16, %v2410_v34  ;;  %v4901_v34 = vsel %vm1842_vm4, %v1874_v61, %v4727_v48 }
  0x59   : > { %v4865_v42 = vsel %vm2386_vm5, %v2416_v45, %v4856_v37 }
  0x5a   : > { %v4849_v60 = vsel %vm2386_vm5, %v2412_v62, %v2416_v45 }
  0x5d   : > { %3659 = vmatmul.mubr.msk.bf16.gmra.mrb[32].mxu1 %vm486_vm3, %v4650_v32  ;;  %v2407_v32 = vrot.slane %v4513_v3, 3 }
  0x5e   : > { %3664 = vmatprep.mubr.msk.bf16.mxu1 %vm486_vm3, %v4411_v6 }
  0x5f   : > { %3829 = vmatmul.mubr.msk.bf16.gmra.mrb[12].mxu0 %vm486_vm3, %v4790_v29  ;;  %v2408_v33 = vor.u32 %v2407_v32, %v2406_v55  ;;  %v1872_v55 = vrot.slane %v4682_v47, 2  ;;  %v4876_v32 = vsel %vm1842_vm4, %v1868_v10, %v1870_v43 }
  0x60   : > { %3832 = vmatprep.mubr.msk.bf16.mxu0 %vm486_vm3, %v4798_v49 }
  0x61   : > { %v4821_v3 = vsel %vm2386_vm5, %v2404_v53, %v2408_v33  ;;  %v4836_v14 = vsel %vm2386_vm5, %v2408_v33, %v2412_v62  ;;  %v4861_v53 = vsel %vm1842_vm4, %v1866_v44, %v1868_v10  ;;  %v4881_v11 = vsel %vm1842_vm4, %v1870_v43, %v1872_v55 }
  0x62   : > { %v4891_v33 = vsel %vm1842_vm4, %v1872_v55, %v1874_v61  ;;  %v2527_v62 = vsel %vm541_vm0, %v4698_v58, 0  ;;  %v942_v58 = vrot.slane %v4414_v7, 1  ;;  %v958_v44 = vrot.slane %v4536_v23, 1 }
  0x63   : > { %v966_v61 = vrot.slane %v4607_v38, 1 }
  0x64   : > { %v5018_v45 = vsel %vm940_vm6, %v956_v40, %v958_v44  ;;  %v5035_v43 = vsel %vm940_vm6, %v958_v44, %v960_v19 }
  0x65   : > { %3665 = vmatmul.mubr.msk.bf16.vlgmr.msra.gmra.mrb[0].mxu1 %vm486_vm3, %v4414_v7 }
  0x66   : > { %3668 = vmatprep.mubr.msk.bf16.mxu1 %vm486_vm3, %v4418_v9  ;;  %3701 = vmatpush3.bf16.msra.mxu1 %v1033_v57  ;;  %v4895_v57 = vcombine.low %v4703_v51, %v4703_v51 }
  0x67   : > { %4259 = vmatprep.subr.msk.bf16.mxu1 %vm541_vm0, %v4818_v4  ;;  %3833 = vmatmul.mubr.msk.bf16.gmra.mrb[16].mxu0 %vm486_vm3, %v4826_v15 }
  0x68   : > { %3836 = vmatprep.mubr.msk.bf16.mxu0 %vm486_vm3, %v4831_v36  ;;  %v1878_v16 = vrot.slane %v4895_v57, 2 }
  0x6a   : > { %v1879_v51 = vsel %vm1842_vm4, %v4727_v48, %v1878_v16  ;;  %v4926_v48 = vld [vmem:[%s5401_s1 + $0x10] sm:$0x3] }
  0x6b   : > { %v2837_v16 = vsel %vm541_vm0, %v4926_v48, 0 }
  0x6d   : > { %3669 = vmatmul.mubr.msk.bf16.gmra.mrb[4].mxu1 %vm486_vm3, %v4432_v17 }
  0x6e   : > { %3672 = vmatprep.mubr.msk.bf16.mxu1 %vm486_vm3, %v4435_v18 }
  0x6f   : > { %3837 = vmatmul.mubr.msk.bf16.gmra.mrb[20].mxu0 %vm486_vm3, %v4854_v35 }
  0x70   : > { %3840 = vmatprep.mubr.msk.bf16.mxu0 %vm486_vm3, %v4861_v53 }
  0x75   : > { %3673 = vmatmul.mubr.msk.bf16.gmra.mrb[8].mxu1 %vm486_vm3, %v4447_v31 }
  0x76   : > { %3676 = vmatprep.mubr.msk.bf16.mxu1 %vm486_vm3, %v4464_v41 }
  0x77   : > { %3841 = vmatmul.mubr.msk.bf16.gmra.mrb[24].mxu0 %vm486_vm3, %v4876_v32 }
  0x78   : > { %3844 = vmatprep.mubr.msk.bf16.mxu0 %vm486_vm3, %v4881_v11 }
  0x7d   : > { %3677 = vmatmul.mubr.msk.bf16.gmra.mrb[12].mxu1 %vm486_vm3, %v4481_v50 }
  0x7e   : > { %3680 = vmatprep.mubr.msk.bf16.mxu1 %vm486_vm3, %v4509_v63 }
  0x7f   : > { %3845 = vmatmul.mubr.msk.bf16.gmra.mrb[28].mxu0 %vm486_vm3, %v4891_v33 }
  0x80   : > { %3848 = vmatprep.mubr.msk.bf16.mxu0 %vm486_vm3, %v4901_v34 }
  0x85   : > { %3681 = vmatmul.mubr.msk.bf16.gmra.mrb[16].mxu1 %vm486_vm3, %v4536_v23 }
  0x86   : > { %3684 = vmatprep.mubr.msk.bf16.mxu1 %vm486_vm3, %v4543_v28 }
  0x87   : > { %3849 = vmatmul.mubr.msk.bf16.gmra.mrb[32].mxu0 %vm486_vm3, %v1879_v51  ;;  %v968_v51 = vrot.slane %v4644_v21, 1 }
  0x88   : > { %3854 = vmatprep.mubr.msk.bf16.mxu0 %vm486_vm3, %v4678_v20 }
  0x8d   : > { %3685 = vmatmul.mubr.msk.bf16.gmra.mrb[20].mxu1 %vm486_vm3, %v4570_v56 }
  0x8e   : > { %3688 = vmatprep.mubr.msk.bf16.mxu1 %vm486_vm3, %v4598_v25 }
  0x8f   : > { %3855 = vmatmul.mubr.msk.bf16.vlgmr.msra.gmra.mrb[0].mxu0 %vm486_vm3, %v4688_v46  ;;  %v941_v46 = vrot.slane %v4411_v6, 1  ;;  %v946_v6 = vrot.slane %v4432_v17, 1 }
  0x90   : > { %3891 = vmatpush3.bf16.msra.mxu0 %v2527_v62  ;;  %3858 = vmatprep.mubr.msk.bf16.mxu0 %vm486_vm3, %v4732_v2  ;;  %v970_v62 = vrot.slane %v4655_v8, 1 }
  0x91   : > { %4265 = vmatprep.subr.msk.bf16.mxu0 %vm541_vm0, %v4926_v48  ;;  %v943_v20 = vsel %vm940_vm6, %v941_v46, %v942_v58  ;;  %v972_v48 = vrot.slane %v4682_v47, 1 }
  0x92   : > { %v5074_v46 = vsel %vm940_vm6, %v968_v51, %v970_v62 }
  0x95   : > { %3689 = vmatmul.mubr.msk.bf16.gmra.mrb[24].mxu1 %vm486_vm3, %v4607_v38 }
  0x96   : > { %3692 = vmatprep.mubr.msk.bf16.mxu1 %vm486_vm3, %v4644_v21 }
  0x97   : > { %3859 = vmatmul.mubr.msk.bf16.gmra.mrb[4].mxu0 %vm486_vm3, %v4743_v59  ;;  %v944_v59 = vrot.slane %v4418_v9, 1 }
  0x98   : > { %3862 = vmatprep.mubr.msk.bf16.mxu0 %vm486_vm3, %v4765_v30  ;;  %v1267_v30 = vsel %vm541_vm0, %v4818_v4, 0 }
  0x99   : > { %v4963_v7 = vsel %vm940_vm6, %v942_v58, %v944_v59  ;;  %v4966_v2 = vsel %vm940_vm6, %v944_v59, %v946_v6 }
  0x9d   : > { %3693 = vmatmul.mubr.msk.bf16.gmra.mrb[28].mxu1 %vm486_vm3, %v4655_v8 }
  0x9e   : > { %3696 = vmatprep.mubr.msk.bf16.mxu1 %vm486_vm3, %v4682_v47 }
  0x9f   : > { %3863 = vmatmul.mubr.msk.bf16.gmra.mrb[8].mxu0 %vm486_vm3, %v4772_v27  ;;  %v948_v27 = vrot.slane %v4435_v18, 1 }
  0xa0   : > { %3866 = vmatprep.mubr.msk.bf16.mxu0 %vm486_vm3, %v4790_v29  ;;  %v950_v29 = vrot.slane %v4447_v31, 1 }
  0xa2   : > { %v4986_v4 = vsel %vm940_vm6, %v948_v27, %v950_v29 }
  0xa5   : > { %3697 = vmatmul.mubr.msk.bf16.gmra.mrb[32].mxu1 %vm486_vm3, %v4590_v13 }
  0xa6   : > { %3702 = vmatprep.mubr.msk.bf16.mxu1 %vm486_vm3, %v943_v20  ;;  %v5454_v20 = vld [vmem:[#allocation5_spill] sm:$0xff] }
  0xa7   : > { %3867 = vmatmul.mubr.msk.bf16.gmra.mrb[12].mxu0 %vm486_vm3, %v4798_v49  ;;  %v4983_v49 = vsel %vm940_vm6, %v946_v6, %v948_v27  ;;  %v976_v59 = vrot.slane %v5454_v20, 1  ;;  %v5455_v6 = vld [vmem:[#allocation4_spill] sm:$0xff]  ;;  %v5465_v20 = vld [vmem:[#allocation14_spill] sm:$0xff] }
  0xa8   : > { %3870 = vmatprep.mubr.msk.bf16.mxu0 %vm486_vm3, %v4826_v15  ;;  %v954_v15 = vrot.slane %v4481_v50, 1 }
  0xaa   : > { %v5015_v10 = vsel %vm940_vm6, %v954_v15, %v956_v40  ;;  %v5458_v40 = vld [vmem:[#allocation8_spill] sm:$0xff] }
  0xab   : > { %v2427_v44 = vrot.slane %v5458_v40, 3 }
  0xad   : > { %3703 = vmatmul.mubr.msk.bf16.vlgmr.msra.gmra.mrb[0].mxu1 %vm486_vm3, %v4963_v7 }
  0xae   : > { %3706 = vmatprep.mubr.msk.bf16.mxu1 %vm486_vm3, %v4966_v2  ;;  %3739 = vmatpush3.bf16.msra.mxu1 %v1267_v30  ;;  %v5456_v30 = vld [vmem:[#allocation3_spill] sm:$0xff] }
  0xaf   : > { %4261 = vmatprep.subr.msk.bf16.mxu1 %vm541_vm0, %v4380_v0  ;;  %3871 = vmatmul.mubr.msk.bf16.gmra.mrb[16].mxu0 %vm486_vm3, %v4831_v36  ;;  %v952_v0 = vrot.slane %v4464_v41, 1  ;;  %v2423_v27 = vrot.slane %v5456_v30, 3 }
  0xb0   : > { %3874 = vmatprep.mubr.msk.bf16.mxu0 %vm486_vm3, %v4854_v35  ;;  %v962_v35 = vrot.slane %v4570_v56, 1 }
  0xb1   : > { %v4999_v36 = vsel %vm940_vm6, %v950_v29, %v952_v0  ;;  %v5002_v22 = vsel %vm940_vm6, %v952_v0, %v954_v15  ;;  %v5457_v0 = vld [vmem:[#allocation9_spill] sm:$0xff] }
  0xb2   : > { %v5038_v55 = vsel %vm940_vm6, %v960_v19, %v962_v35  ;;  %v2426_v15 = vrot.slane %v5457_v0, 2 }
  0xb5   : > { %3707 = vmatmul.mubr.msk.bf16.gmra.mrb[4].mxu1 %vm486_vm3, %v4983_v49 }
  0xb6   : > { %3710 = vmatprep.mubr.msk.bf16.mxu1 %vm486_vm3, %v4986_v4 }
  0xb7   : > { %3875 = vmatmul.mubr.msk.bf16.gmra.mrb[20].mxu0 %vm486_vm3, %v4861_v53  ;;  %v2160_v53 = vrot.slane %v5023_v52, 2 }
  0xb8   : > { %3878 = vmatprep.mubr.msk.bf16.mxu0 %vm486_vm3, %v4876_v32  ;;  %v5453_v32 = vrot.slane %v4713_v12, 2 }
  0xbd   : > { %3711 = vmatmul.mubr.msk.bf16.gmra.mrb[8].mxu1 %vm486_vm3, %v4999_v36 }
  0xbe   : > { %3714 = vmatprep.mubr.msk.bf16.mxu1 %vm486_vm3, %v5002_v22 }
  0xbf   : > { %3879 = vmatmul.mubr.msk.bf16.gmra.mrb[24].mxu0 %vm486_vm3, %v4881_v11  ;;  %v2161_v11 = vsel %vm1842_vm4, %v5453_v32, %v2160_v53  ;;  %v5460_v53 = vld [vmem:[#allocation10_spill] sm:$0xff]  ;;  %v2428_v32 = vor.u32 %v2427_v44, %v2426_v15 }
  0xc0   : > { %3882 = vmatprep.mubr.msk.bf16.mxu0 %vm486_vm3, %v4891_v33  ;;  %v5468_v15 = vld [vmem:[#allocation6_spill] sm:$0xff] }
  0xc1   : > { %v2446_v44 = vrot.slane %v5468_v15, 2 }
  0xc5   : > { %3715 = vmatmul.mubr.msk.bf16.gmra.mrb[12].mxu1 %vm486_vm3, %v5015_v10 }
  0xc6   : > { %3718 = vmatprep.mubr.msk.bf16.mxu1 %vm486_vm3, %v5018_v45 }
  0xc7   : > { %3883 = vmatmul.mubr.msk.bf16.gmra.mrb[28].mxu0 %vm486_vm3, %v4901_v34 }
  0xc8   : > { %3886 = vmatprep.mubr.msk.bf16.mxu0 %vm486_vm3, %v4739_v1  ;;  %v964_v1 = vrot.slane %v4598_v25, 1 }
  0xca   : > { %v5053_v33 = vsel %vm940_vm6, %v962_v35, %v964_v1  ;;  %v5056_v34 = vsel %vm940_vm6, %v964_v1, %v966_v61 }
  0xcd   : > { %3719 = vmatmul.mubr.msk.bf16.gmra.mrb[16].mxu1 %vm486_vm3, %v5035_v43 }
  0xce   : > { %3722 = vmatprep.mubr.msk.bf16.mxu1 %vm486_vm3, %v5038_v55 }
  0xcf   : > { %3887 = vmatmul.mubr.msk.bf16.gmra.mrb[32].mxu0 %vm486_vm3, %v2161_v11 }
  0xd0   : > { %3892 = vmatprep.mubr.msk.bf16.mxu0 %vm486_vm3, %v4768_v26  ;;  %v5071_v26 = vsel %vm940_vm6, %v966_v61, %v968_v51 }
  0xd5   : > { %3723 = vmatmul.mubr.msk.bf16.gmra.mrb[20].mxu1 %vm486_vm3, %v5053_v33 }
  0xd6   : > { %3726 = vmatprep.mubr.msk.bf16.mxu1 %vm486_vm3, %v5056_v34 }
  0xd7   : > { %3893 = vmatmul.mubr.msk.bf16.vlgmr.msra.gmra.mrb[0].mxu0 %vm486_vm3, %v4775_v5  ;;  %v5082_v5 = vrot.slane %v4590_v13, 1 }
  0xd8   : > { %3929 = vmatpush3.bf16.msra.mxu0 %v2837_v16  ;;  %3896 = vmatprep.mubr.msk.bf16.mxu0 %vm486_vm3, %v4793_v24  ;;  %v5089_v24 = vsel %vm940_vm6, %v970_v62, %v972_v48  ;;  %v5462_v16 = vld [vmem:[#allocation11_spill] sm:$0xff]  ;;  %v5463_v62 = vld [vmem:[#allocation2_spill] sm:$0xff] }
  0xd9   : > { %v5093_v58 = vsel %vm940_vm6, %v972_v48, %v5082_v5 }
  0xdd   : > { %3727 = vmatmul.mubr.msk.bf16.gmra.mrb[24].mxu1 %vm486_vm3, %v5071_v26 }
  0xde   : > { %3730 = vmatprep.mubr.msk.bf16.mxu1 %vm486_vm3, %v5074_v46 }
  0xdf   : > { %3897 = vmatmul.mubr.msk.bf16.gmra.mrb[4].mxu0 %vm486_vm3, %v4803_v54  ;;  %v2422_v54 = vrot.slane %v5455_v6, 2 }
  0xe0   : > { %3900 = vmatprep.mubr.msk.bf16.mxu0 %vm486_vm3, %v4821_v3  ;;  %v977_v3 = vsel %vm940_vm6, %v5082_v5, %v976_v59  ;;  %v2439_v59 = vrot.slane %v5465_v20, 3 }
  0xe1   : > { %v2424_v29 = vor.u32 %v2423_v27, %v2422_v54  ;;  %v5467_v27 = vld [vmem:[#allocation16_spill] sm:$0xff] }
  0xe3   : > { %v2425_v19 = vsel %vm2386_vm5, %v4856_v37, %v2424_v29  ;;  %v2429_v1 = vsel %vm2386_vm5, %v2424_v29, %v2428_v32  ;;  %v2435_v37 = vrot.slane %v5462_v16, 3 }
  0xe5   : > { %3731 = vmatmul.mubr.msk.bf16.gmra.mrb[28].mxu1 %vm486_vm3, %v5089_v24 }
  0xe6   : > { %3734 = vmatprep.mubr.msk.bf16.mxu1 %vm486_vm3, %v5093_v58 }
  0xe7   : > { %3901 = vmatmul.mubr.msk.bf16.gmra.mrb[8].mxu0 %vm486_vm3, %v4836_v14  ;;  %v5459_v14 = vld [vmem:[#allocation12_spill] sm:$0xff] }
  0xe8   : > { %3904 = vmatprep.mubr.msk.bf16.mxu0 %vm486_vm3, %v4849_v60  ;;  %v2430_v35 = vrot.slane %v5459_v14, 2  ;;  %v2431_v60 = vrot.slane %v5460_v53, 3 }
  0xea   : > { %v2432_v11 = vor.u32 %v2431_v60, %v2430_v35  ;;  %v5469_v35 = vld [vmem:[#allocation15_spill] sm:$0xff] }
  0xeb   : > { %v1553_v60 = vshrl.u32 %v5469_v35, 16 }
  0xec   : > { %v2433_v51 = vsel %vm2386_vm5, %v2428_v32, %v2432_v11  ;;  %v1556_v32 = vshll.u32 %v5469_v35, 16 }
  0xed   : > { %3735 = vmatmul.mubr.msk.bf16.gmra.mrb[32].mxu1 %vm486_vm3, %v977_v3  ;;  %v2443_v3 = vrot.slane %v5467_v27, 3 }
  0xee   : > { %3740 = vmatprep.mubr.msk.bf16.mxu1 %vm486_vm3, %v4963_v7  ;;  %v5461_v7 = vld [vmem:[#allocation13_spill] sm:$0xff] }
  0xef   : > { %3905 = vmatmul.mubr.msk.bf16.gmra.mrb[12].mxu0 %vm486_vm3, %v4865_v42  ;;  %v2434_v61 = vrot.slane %v5461_v7, 2  ;;  %v5464_v42 = vld [vmem:[#allocation17_spill] sm:$0xff] }
  0xf0   : > { %3908 = vmatprep.mubr.msk.bf16.mxu0 %vm486_vm3, %v2425_v19  ;;  %v2438_v48 = vrot.slane %v5464_v42, 2  ;;  %v2447_v19 = vrot.slane %v4610_v39, 3 }
  0xf2   : > { %v2440_v6 = vor.u32 %v2439_v59, %v2438_v48 }
  0xf5   : > { %3741 = vmatmul.mubr.msk.bf16.vlgmr.msra.gmra.mrb[0].mxu1 %vm486_vm3, %v4966_v2  ;;  %v2436_v2 = vor.u32 %v2435_v37, %v2434_v61  ;;  %v2450_v37 = vrot.slane %v1553_v60, 2 }
  0xf6   : > { %3744 = vmatprep.mubr.msk.bf16.mxu1 %vm486_vm3, %v4983_v49  ;;  %3967 = vmatpush3.bf16.msra.mxu1 %v5463_v62  ;;  %v5466_v49 = vld [vmem:[#allocation18_spill] sm:$0xff] }
  0xf7   : > { %3909 = vmatmul.mubr.msk.bf16.gmra.mrb[16].mxu0 %vm486_vm3, %v2429_v1  ;;  %v2437_v54 = vsel %vm2386_vm5, %v2432_v11, %v2436_v2  ;;  %v2442_v30 = vrot.slane %v5466_v49, 2  ;;  %v2441_v29 = vsel %vm2386_vm5, %v2436_v2, %v2440_v6  ;;  %v2448_v11 = vor.u32 %v2447_v19, %v2446_v44 }
  0xf8   : > { %3912 = vmatprep.mubr.msk.bf16.mxu0 %vm486_vm3, %v2433_v51  ;;  %v2455_v1 = vshrl.u32 %v4713_v12, 16  ;;  %v2451_v51 = vrot.slane %v1556_v32, 3  ;;  %v2464_v2 = vshrl.u32 %v5023_v52, 16  ;;  %v2745_v19 = vrot.slane %v4418_v9, 3 }
  0xf9   : > { %v2750_v9 = vrot.slane %v4447_v31, 3 }
  0xfa   : > { %v2457_v48 = vrot.slane %v2455_v1, 2  ;;  %v1528_v1 = vrot.slane %v5457_v0, 1  ;;  %v2762_v0 = vrot.slane %v4570_v56, 3 }
  0xfd   : > { %3745 = vmatmul.mubr.msk.bf16.gmra.mrb[4].mxu1 %vm486_vm3, %v4986_v4  ;;  %v2444_v4 = vor.u32 %v2443_v3, %v2442_v30 }
  0xfe   : > { %3748 = vmatprep.mubr.msk.bf16.mxu1 %vm486_vm3, %v4999_v36  ;;  %v2458_v36 = vshll.u32 %v4713_v12, 16 }
  0xff   : > { %3913 = vmatmul.mubr.msk.bf16.gmra.mrb[20].mxu0 %vm486_vm3, %v2437_v54  ;;  %v2445_v61 = vsel %vm2386_vm5, %v2440_v6, %v2444_v4  ;;  %v2449_v62 = vsel %vm2386_vm5, %v2444_v4, %v2448_v11  ;;  %v2467_v6 = vshll.u32 %v5023_v52, 16  ;;  %v2746_v4 = vrot.slane %v4432_v17, 3 }
 0x100   : > { %3916 = vmatprep.mubr.msk.bf16.mxu0 %vm486_vm3, %v2441_v29  ;;  %v2460_v59 = vrot.slane %v2458_v36, 3  ;;  %v1529_v36 = vrot.slane %v5458_v40, 2  ;;  %v1533_v40 = vrot.slane %v5460_v53, 2 }
 0x101   : > { %v2469_v3 = vrot.slane %v2467_v6, 3  ;;  %v1541_v6 = vrot.slane %v5465_v20, 2 }
 0x102   : > { %v2461_v54 = vor.u32 %v2460_v59, %v2457_v48  ;;  %v1536_v48 = vrot.slane %v5461_v7, 1  ;;  %v1537_v59 = vrot.slane %v5462_v16, 2  ;;  %v2766_v7 = vrot.slane %v4607_v38, 3 }
 0x103   : > { %v1540_v16 = vrot.slane %v5464_v42, 1  ;;  %v2768_v42 = vrot.slane %v4644_v21, 3 }
 0x105   : > { %3749 = vmatmul.mubr.msk.bf16.gmra.mrb[8].mxu1 %vm486_vm3, %v5002_v22  ;;  %v2452_v22 = vor.u32 %v2451_v51, %v2450_v37  ;;  %v1530_v37 = vor.u32 %v1529_v36, %v1528_v1  ;;  %v5470_v51 = vld [vmem:[#allocation7_spill] sm:$0xff]  ;;  %v2769_v21 = vsel %vm2744_vm7, %v2766_v7, %v2768_v42 }
 0x106   : > { %3752 = vmatprep.mubr.msk.bf16.mxu1 %vm486_vm3, %v5015_v10  ;;  %v2466_v10 = vrot.slane %v2464_v2, 2  ;;  %v1538_v2 = vor.u32 %v1537_v59, %v1536_v48 }
 0x107   : > { %3917 = vmatmul.mubr.msk.bf16.gmra.mrb[24].mxu0 %vm486_vm3, %v2445_v61  ;;  %v2453_v30 = vsel %vm2386_vm5, %v2448_v11, %v2452_v22  ;;  %v2462_v29 = vsel %vm2386_vm5, %v2452_v22, %v2461_v54  ;;  %v2748_v11 = vrot.slane %v4435_v18, 3  ;;  %v2754_v18 = vrot.slane %v4481_v50, 3 }
 0x108   : > { %3920 = vmatprep.mubr.msk.bf16.mxu0 %vm486_vm3, %v2449_v62  ;;  %v2470_v44 = vor.u32 %v2469_v3, %v2466_v10  ;;  %v2758_v50 = vrot.slane %v4536_v23, 3  ;;  %v2760_v23 = vrot.slane %v4543_v28, 3  ;;  %v1531_v62 = vsel %vm1484_vm2, %v5470_v51, %v1530_v37 }
 0x109   : > { %v2749_v17 = vsel %vm2744_vm7, %v2746_v4, %v2748_v11  ;;  %v1545_v10 = vrot.slane %v5467_v27, 2  ;;  %v1548_v27 = vrot.slane %v5468_v15, 1  ;;  %v1562_v15 = vshrl.u32 %v4895_v57, 16 }
 0x10a   : > { %v2761_v22 = vsel %vm2744_vm7, %v2758_v50, %v2760_v23  ;;  %v2763_v28 = vsel %vm2744_vm7, %v2760_v23, %v2762_v0 }
 0x10d   : > { %3753 = vmatmul.mubr.msk.bf16.gmra.mrb[12].mxu1 %vm486_vm3, %v5018_v45  ;;  %v2471_v45 = vsel %vm2386_vm5, %v2461_v54, %v2470_v44  ;;  %v1549_v44 = vrot.slane %v4610_v39, 2  ;;  %v1565_v39 = vshll.u32 %v4895_v57, 16 }
 0x10e   : > { %3756 = vmatprep.mubr.msk.bf16.mxu1 %vm486_vm3, %v5035_v43  ;;  %v2747_v43 = vsel %vm2744_vm7, %v2745_v19, %v2746_v4  ;;  %v1555_v4 = vrot.slane %v1553_v60, 1  ;;  %v2772_v60 = vrot.slane %v4682_v47, 3  ;;  %v2776_v47 = vrot.slane %v5469_v35, 3 }
 0x10f   : > { %3921 = vmatmul.mubr.msk.bf16.gmra.mrb[28].mxu0 %vm486_vm3, %v2453_v30  ;;  %v1544_v30 = vrot.slane %v5466_v49, 1  ;;  %v2770_v49 = vrot.slane %v4655_v8, 3 }
 0x110   : > { %3924 = vmatprep.mubr.msk.bf16.mxu0 %vm486_vm3, %v2462_v29  ;;  %v1542_v29 = vor.u32 %v1541_v6, %v1540_v16 }
 0x111   : > { %v1546_v38 = vor.u32 %v1545_v10, %v1544_v30  ;;  %v2771_v8 = vsel %vm2744_vm7, %v2768_v42, %v2770_v49 }
 0x112   : > { %v1543_v20 = vsel %vm1484_vm2, %v1538_v2, %v1542_v29 }
 0x113   : > { %v1547_v19 = vsel %vm1484_vm2, %v1542_v29, %v1546_v38 }
 0x115   : > { %3757 = vmatmul.mubr.msk.bf16.gmra.mrb[16].mxu1 %vm486_vm3, %v5038_v55  ;;  %v2751_v55 = vsel %vm2744_vm7, %v2748_v11, %v2750_v9 }
 0x116   : > { %3760 = vmatprep.mubr.msk.bf16.mxu1 %vm486_vm3, %v5053_v33  ;;  %v2752_v33 = vrot.slane %v4464_v41, 3  ;;  %v2756_v41 = vrot.slane %v4509_v63, 3  ;;  %v1258_v63 = vrot.slane %v4895_v57, 1 }
 0x117   : > { %3925 = vmatmul.mubr.msk.bf16.gmra.mrb[32].mxu0 %vm486_vm3, %v2471_v45  ;;  %v1558_v45 = vrot.slane %v1556_v32, 2 }
 0x118   : > { %3930 = vmatprep.mubr.msk.bf16.mxu0 %vm486_vm3, %v2747_v43  ;;  %v2753_v31 = vsel %vm2744_vm7, %v2750_v9, %v2752_v33  ;;  %v2759_v61 = vsel %vm2744_vm7, %v2756_v41, %v2758_v50  ;;  %v1550_v43 = vor.u32 %v1549_v44, %v1548_v27  ;;  %v2774_v9 = vrot.slane %v4590_v13, 3 }
 0x119   : > { %v1559_v11 = vor.u32 %v1558_v45, %v1555_v4  ;;  %v2780_v50 = vrot.slane %v5023_v52, 3 }
 0x11a   : > { %v1551_v32 = vsel %vm1484_vm2, %v1546_v38, %v1550_v43  ;;  %v2775_v57 = vsel %vm2744_vm7, %v2772_v60, %v2774_v9 }
 0x11d   : > { %3761 = vmatmul.mubr.msk.bf16.gmra.mrb[20].mxu1 %vm486_vm3, %v5056_v34  ;;  %v2755_v34 = vsel %vm2744_vm7, %v2752_v33, %v2754_v18  ;;  %v1560_v33 = vsel %vm1484_vm2, %v1550_v43, %v1559_v11 }
 0x11e   : > { %3764 = vmatprep.mubr.msk.bf16.mxu1 %vm486_vm3, %v5071_v26  ;;  %v1256_v26 = vrot.slane %v5469_v35, 1 }
 0x11f   : > { %3931 = vmatmul.mubr.msk.bf16.vlgmr.msra.gmra.mrb[0].mxu0 %vm486_vm3, %v2749_v17  ;;  %v1564_v17 = vrot.slane %v1562_v15, 1 }
 0x120   : > { %3934 = vmatprep.mubr.msk.bf16.mxu0 %vm486_vm3, %v2751_v55  ;;  %v1567_v55 = vrot.slane %v1565_v39, 2 }
 0x125   : > { %3765 = vmatmul.mubr.msk.bf16.gmra.mrb[24].mxu1 %vm486_vm3, %v5074_v46  ;;  %v1257_v46 = vsel %vm940_vm6, %v5082_v5, %v1256_v26  ;;  %v1259_v5 = vsel %vm940_vm6, %v1256_v26, %v1258_v63  ;;  %v2777_v26 = vsel %vm2744_vm7, %v2774_v9, %v2776_v47 }
 0x126   : > { %3768 = vmatprep.mubr.msk.bf16.mxu1 %vm486_vm3, %v5089_v24  ;;  %v2757_v24 = vsel %vm2744_vm7, %v2754_v18, %v2756_v41  ;;  %v2773_v18 = vsel %vm2744_vm7, %v2770_v49, %v2772_v60 }
 0x127   : > { %3935 = vmatmul.mubr.msk.bf16.gmra.mrb[4].mxu0 %vm486_vm3, %v2753_v31  ;;  %v1568_v31 = vor.u32 %v1567_v55, %v1564_v17 }
 0x128   : > { %3938 = vmatprep.mubr.msk.bf16.mxu0 %vm486_vm3, %v2755_v34  ;;  %v2778_v34 = vrot.slane %v4713_v12, 3 }
 0x129   : > { %v1569_v13 = vsel %vm1484_vm2, %v1559_v11, %v1568_v31 }
 0x12a   : > { %v2779_v41 = vsel %vm2744_vm7, %v2776_v47, %v2778_v34 }
 0x12d   : > { %3769 = vmatmul.mubr.msk.bf16.gmra.mrb[28].mxu1 %vm486_vm3, %v5093_v58  ;;  %v1532_v58 = vrot.slane %v5459_v14, 1  ;;  %v2764_v14 = vrot.slane %v4598_v25, 3 }
 0x12e   : > { %3772 = vmatprep.mubr.msk.bf16.mxu1 %vm486_vm3, %v1257_v46  ;;  %v2781_v46 = vsel %vm2744_vm7, %v2778_v34, %v2780_v50 }
 0x12f   : > { %3939 = vmatmul.mubr.msk.bf16.gmra.mrb[8].mxu0 %vm486_vm3, %v2757_v24  ;;  %v1534_v56 = vor.u32 %v1533_v40, %v1532_v58  ;;  %v2765_v3 = vsel %vm2744_vm7, %v2762_v0, %v2764_v14  ;;  %v2767_v25 = vsel %vm2744_vm7, %v2764_v14, %v2766_v7 }
 0x130   : > { %3942 = vmatprep.mubr.msk.bf16.mxu0 %vm486_vm3, %v2759_v61 }
 0x131   : > { %v1535_v53 = vsel %vm1484_vm2, %v1530_v37, %v1534_v56  ;;  %v1539_v54 = vsel %vm1484_vm2, %v1534_v56, %v1538_v2  ;;  %v5304_v2 = vld [vmem:[%s5402_s2] ss:$0 sm:$0xff] }
 0x135   : > { %3773 = vmatmul.mubr.msk.bf16.gmra.mrb[32].mxu1 %vm486_vm3, %v1259_v5 }
 0x136   : > { %3798 = vmatprep.mubr.msk.bf16.mxu1 %vm486_vm3, %v1531_v62 }
 0x137   : > { %3943 = vmatmul.mubr.msk.bf16.gmra.mrb[12].mxu0 %vm486_vm3, %v2761_v22 }
 0x138   : > { %3946 = vmatprep.mubr.msk.bf16.mxu0 %vm486_vm3, %v2763_v28 }
 0x13d   : > { %3799 = vmatmul.mubr.msk.bf16.vlgmr.msra.gmra.mrb[20].mxu1 %vm486_vm3, %v1535_v53 }
 0x13e   : > { %3802 = vmatprep.mubr.msk.bf16.mxu1 %vm486_vm3, %v1539_v54 }
 0x13f   : > { %3947 = vmatmul.mubr.msk.bf16.gmra.mrb[16].mxu0 %vm486_vm3, %v2765_v3 }
 0x140   : > { %3950 = vmatprep.mubr.msk.bf16.mxu0 %vm486_vm3, %v2767_v25 }
 0x145   : > { %3803 = vmatmul.mubr.msk.bf16.gmra.mrb[24].mxu1 %vm486_vm3, %v1543_v20 }
 0x146   : > { %3806 = vmatprep.mubr.msk.bf16.mxu1 %vm486_vm3, %v1547_v19 }
 0x147   : > { %3951 = vmatmul.mubr.msk.bf16.gmra.mrb[20].mxu0 %vm486_vm3, %v2769_v21 }
 0x148   : > { %3954 = vmatprep.mubr.msk.bf16.mxu0 %vm486_vm3, %v2771_v8 }
 0x14d   : > { %3807 = vmatmul.mubr.msk.bf16.gmra.mrb[28].mxu1 %vm486_vm3, %v1551_v32 }
 0x14e   : > { %3810 = vmatprep.mubr.msk.bf16.mxu1 %vm486_vm3, %v1560_v33 }
 0x14f   : > { %3955 = vmatmul.mubr.msk.bf16.gmra.mrb[24].mxu0 %vm486_vm3, %v2773_v18 }
 0x150   : > { %3958 = vmatprep.mubr.msk.bf16.mxu0 %vm486_vm3, %v2775_v57 }
 0x155   : > { %3811 = vmatmul.mubr.msk.bf16.gmra.mrb[32].mxu1 %vm486_vm3, %v1569_v13 }
 0x157   : > { %3959 = vmatmul.mubr.msk.bf16.gmra.mrb[28].mxu0 %vm486_vm3, %v2777_v26 }
 0x158   : > { %3962 = vmatprep.mubr.msk.bf16.mxu0 %vm486_vm3, %v2779_v41 }
 0x15f   : > { %3963 = vmatmul.mubr.msk.bf16.gmra.mrb[32].mxu0 %vm486_vm3, %v2781_v46 }
 0x1c8   : > { %v3742_v35 = vpop.f32.mrb[0].mxu1 }
 0x1c9   : > { %v1303_v1 = vpop.f32.mrb[1].mxu1 }
 0x1ca   : > { %v3743_v36 = vpop.f32.mrb[2].mxu1 }
 0x1cb   : > { %v1306_v12 = vpop.f32.mrb[3].mxu1 }
 0x1d0   : > { %v3746_v24 = vpop.f32.mrb[4].mxu1 }
 0x1d1   : > { %v1319_v61 = vpop.f32.mrb[5].mxu1 }
 0x1d2   : > { %v3747_v63 = vpop.f32.mrb[6].mxu1 }
 0x1d3   : > { %v1322_v37 = vpop.f32.mrb[7].mxu1 }
 0x1d8   : > { %v3750_v23 = vpop.f32.mrb[8].mxu1 }
 0x1d9   : > { %v1335_v5 = vpop.f32.mrb[9].mxu1 }
 0x1da   : > { %v3751_v0 = vpop.f32.mrb[10].mxu1 }
 0x1db   : > { %v1338_v58 = vpop.f32.mrb[11].mxu1 }
 0x1e0   : > { %v5284_v40 = vpop.f32.mrb[12].mxu1 }
 0x1e1   : > { %v5286_v52 = vpop.f32.mrb[13].mxu1 }
 0x1e2   : > { %v5288_v51 = vpop.f32.mrb[14].mxu1 }
 0x1e3   : > { %v5290_v62 = vpop.f32.mrb[15].mxu1 }
 0x1e8   : > { %v5292_v48 = vpop.f32.mrb[16].mxu1 }
 0x1e9   : > { %v5294_v59 = vpop.f32.mrb[17].mxu1 }
 0x1ea   : > { %v5296_v22 = vpop.f32.mrb[18].mxu1 }
 0x1eb   : > { %v5298_v28 = vpop.f32.mrb[19].mxu1 }
 0x1f2   : > { %v3932_v56 = vpop.f32.mrb[0].mxu0 }
 0x1f3   : > { %v3968_v14 = vadd.f32 %v3932_v56, %v3742_v35  ;;  %v2873_v53 = vpop.f32.mrb[1].mxu0 }
 0x1f4   : > { %v3969_v7 = vadd.f32 %v2873_v53, %v1303_v1  ;;  %v3933_v16 = vpop.f32.mrb[2].mxu0 }
 0x1f5   : > { %v3061_v6 = vadd.f32 %v3968_v14, %v5304_v2  ;;  %v3970_v54 = vadd.f32 %v3933_v16, %v3743_v36  ;;  %v2876_v30 = vpop.f32.mrb[3].mxu0 }
 0x1f6   : > { %v3059_v10 = vadd.f32 %v3969_v7, %v5304_v2  ;;  %v3971_v3 = vadd.f32 %v2876_v30, %v1306_v12 }
 0x1f7   : > { %v3097_v25 = vmax.f32 %v3061_v6, 0.0  ;;  %v3062_v29 = vadd.f32 %v3970_v54, %v5304_v2 }
 0x1f8   : > { %v3095_v38 = vmax.f32 %v3059_v10, 0.0  ;;  %v3060_v42 = vadd.f32 %v3971_v3, %v5304_v2 }
 0x1f9   : > { %3133 = vst [vmem:[%s5310_s20 + $0x10] sm:$0xff] %v3097_v25  ;;  %v3098_v20 = vmax.f32 %v3062_v29, 0.0 }
 0x1fa   : > { %3131 = vst [vmem:[%s5310_s20] sm:$0xff] %v3095_v38  ;;  %v3096_v49 = vmax.f32 %v3060_v42, 0.0  ;;  %v3936_v27 = vpop.f32.mrb[4].mxu0 }
 0x1fb   : > { %3134 = vst [vmem:[%s5310_s20 + $0x18] sm:$0xff] %v3098_v20  ;;  %v3972_v44 = vadd.f32 %v3936_v27, %v3746_v24  ;;  %v2889_v19 = vpop.f32.mrb[5].mxu0 }
 0x1fc   : > { %3132 = vst [vmem:[%s5310_s20 + $0x8] sm:$0xff] %v3096_v49  ;;  %v3973_v4 = vadd.f32 %v2889_v19, %v1319_v61  ;;  %v3937_v45 = vpop.f32.mrb[6].mxu0 }
 0x1fd   : > { %v3065_v21 = vadd.f32 %v3972_v44, %v5304_v2  ;;  %v3974_v8 = vadd.f32 %v3937_v45, %v3747_v63  ;;  %v2892_v43 = vpop.f32.mrb[7].mxu0 }
 0x1fe   : > { %v3063_v15 = vadd.f32 %v3973_v4, %v5304_v2  ;;  %v3975_v39 = vadd.f32 %v2892_v43, %v1322_v37 }
 0x1ff   : > { %v3101_v11 = vmax.f32 %v3065_v21, 0.0  ;;  %v3066_v60 = vadd.f32 %v3974_v8, %v5304_v2 }
 0x200   : > { %v3099_v32 = vmax.f32 %v3063_v15, 0.0  ;;  %v3064_v9 = vadd.f32 %v3975_v39, %v5304_v2 }
 0x201   : > { %3137 = vst [vmem:[%s5310_s20 + $0x30] sm:$0xff] %v3101_v11  ;;  %v3102_v17 = vmax.f32 %v3066_v60, 0.0 }
 0x202   : > { %3135 = vst [vmem:[%s5310_s20 + $0x20] sm:$0xff] %v3099_v32  ;;  %v3100_v55 = vmax.f32 %v3064_v9, 0.0  ;;  %v3940_v33 = vpop.f32.mrb[8].mxu0 }
 0x203   : > { %3138 = vst [vmem:[%s5310_s20 + $0x38] sm:$0xff] %v3102_v17  ;;  %v3976_v18 = vadd.f32 %v3940_v33, %v3750_v23  ;;  %v2905_v57 = vpop.f32.mrb[9].mxu0 }
 0x204   : > { %3136 = vst [vmem:[%s5310_s20 + $0x28] sm:$0xff] %v3100_v55  ;;  %v3977_v31 = vadd.f32 %v2905_v57, %v1335_v5  ;;  %v3941_v47 = vpop.f32.mrb[10].mxu0 }
 0x205   : > { %v3069_v13 = vadd.f32 %v3976_v18, %v5304_v2  ;;  %v3978_v34 = vadd.f32 %v3941_v47, %v3751_v0  ;;  %v2908_v26 = vpop.f32.mrb[11].mxu0 }
 0x206   : > { %v3067_v41 = vadd.f32 %v3977_v31, %v5304_v2  ;;  %v3979_v50 = vadd.f32 %v2908_v26, %v1338_v58 }
 0x207   : > { %v3105_v46 = vmax.f32 %v3069_v13, 0.0  ;;  %v3070_v35 = vadd.f32 %v3978_v34, %v5304_v2 }
 0x208   : > { %v3103_v1 = vmax.f32 %v3067_v41, 0.0  ;;  %v3068_v36 = vadd.f32 %v3979_v50, %v5304_v2 }
 0x209   : > { %3141 = vst [vmem:[%s5310_s20 + $0x50] sm:$0xff] %v3105_v46  ;;  %v3106_v12 = vmax.f32 %v3070_v35, 0.0 }
 0x20a   : > { %3139 = vst [vmem:[%s5310_s20 + $0x40] sm:$0xff] %v3103_v1  ;;  %v3104_v24 = vmax.f32 %v3068_v36, 0.0  ;;  %v3944_v61 = vpop.f32.mrb[12].mxu0 }
 0x20b   : > { %3142 = vst [vmem:[%s5310_s20 + $0x58] sm:$0xff] %v3106_v12  ;;  %v3980_v63 = vadd.f32 %v3944_v61, %v5284_v40  ;;  %v2921_v37 = vpop.f32.mrb[13].mxu0 }
 0x20c   : > { %3140 = vst [vmem:[%s5310_s20 + $0x48] sm:$0xff] %v3104_v24  ;;  %v3981_v23 = vadd.f32 %v2921_v37, %v5286_v52  ;;  %v3945_v5 = vpop.f32.mrb[14].mxu0 }
 0x20d   : > { %v3073_v0 = vadd.f32 %v3980_v63, %v5304_v2  ;;  %v3982_v58 = vadd.f32 %v3945_v5, %v5288_v51  ;;  %v2924_v56 = vpop.f32.mrb[15].mxu0 }
 0x20e   : > { %v3071_v14 = vadd.f32 %v3981_v23, %v5304_v2  ;;  %v3983_v53 = vadd.f32 %v2924_v56, %v5290_v62 }
 0x20f   : > { %v3109_v7 = vmax.f32 %v3073_v0, 0.0  ;;  %v3074_v40 = vadd.f32 %v3982_v58, %v5304_v2 }
 0x210   : > { %v3800_v16 = vpop.f32.mrb[20].mxu1  ;;  %v3107_v6 = vmax.f32 %v3071_v14, 0.0  ;;  %v3072_v52 = vadd.f32 %v3983_v53, %v5304_v2 }
 0x211   : > { %v1741_v54 = vpop.f32.mrb[21].mxu1  ;;  %3145 = vst [vmem:[%s5310_s20 + $0x70] sm:$0xff] %v3109_v7  ;;  %v3110_v30 = vmax.f32 %v3074_v40, 0.0 }
 0x212   : > { %v3801_v10 = vpop.f32.mrb[22].mxu1  ;;  %3143 = vst [vmem:[%s5310_s20 + $0x60] sm:$0xff] %v3107_v6  ;;  %v3108_v51 = vmax.f32 %v3072_v52, 0.0  ;;  %v3948_v3 = vpop.f32.mrb[16].mxu0 }
 0x213   : > { %v1744_v25 = vpop.f32.mrb[23].mxu1  ;;  %3146 = vst [vmem:[%s5310_s20 + $0x78] sm:$0xff] %v3110_v30  ;;  %v3984_v29 = vadd.f32 %v3948_v3, %v5292_v48  ;;  %v2937_v62 = vpop.f32.mrb[17].mxu0 }
 0x214   : > { %3144 = vst [vmem:[%s5310_s20 + $0x68] sm:$0xff] %v3108_v51  ;;  %v3985_v38 = vadd.f32 %v2937_v62, %v5294_v59  ;;  %v3949_v42 = vpop.f32.mrb[18].mxu0 }
 0x215   : > { %v3077_v20 = vadd.f32 %v3984_v29, %v5304_v2  ;;  %v3986_v49 = vadd.f32 %v3949_v42, %v5296_v22  ;;  %v2940_v27 = vpop.f32.mrb[19].mxu0 }
 0x216   : > { %v3075_v44 = vadd.f32 %v3985_v38, %v5304_v2  ;;  %v3987_v19 = vadd.f32 %v2940_v27, %v5298_v28 }
 0x217   : > { %v3113_v4 = vmax.f32 %v3077_v20, 0.0  ;;  %v3078_v48 = vadd.f32 %v3986_v49, %v5304_v2 }
 0x218   : > { %v3804_v45 = vpop.f32.mrb[24].mxu1  ;;  %v3111_v21 = vmax.f32 %v3075_v44, 0.0  ;;  %v3076_v59 = vadd.f32 %v3987_v19, %v5304_v2 }
 0x219   : > { %v1757_v8 = vpop.f32.mrb[25].mxu1  ;;  %3149 = vst [vmem:[%s5310_s20 + $0x90] sm:$0xff] %v3113_v4  ;;  %v3114_v43 = vmax.f32 %v3078_v48, 0.0 }
 0x21a   : > { %v3805_v15 = vpop.f32.mrb[26].mxu1  ;;  %3147 = vst [vmem:[%s5310_s20 + $0x80] sm:$0xff] %v3111_v21  ;;  %v3112_v22 = vmax.f32 %v3076_v59, 0.0  ;;  %v3952_v39 = vpop.f32.mrb[20].mxu0 }
 0x21b   : > { %v1760_v11 = vpop.f32.mrb[27].mxu1  ;;  %3150 = vst [vmem:[%s5310_s20 + $0x98] sm:$0xff] %v3114_v43  ;;  %v3988_v60 = vadd.f32 %v3952_v39, %v3800_v16  ;;  %v2953_v28 = vpop.f32.mrb[21].mxu0 }
 0x21c   : > { %3148 = vst [vmem:[%s5310_s20 + $0x88] sm:$0xff] %v3112_v22  ;;  %v3989_v32 = vadd.f32 %v2953_v28, %v1741_v54  ;;  %v3953_v9 = vpop.f32.mrb[22].mxu0 }
 0x21d   : > { %v3081_v17 = vadd.f32 %v3988_v60, %v5304_v2  ;;  %v3990_v55 = vadd.f32 %v3953_v9, %v3801_v10  ;;  %v2956_v33 = vpop.f32.mrb[23].mxu0 }
 0x21e   : > { %v3079_v18 = vadd.f32 %v3989_v32, %v5304_v2  ;;  %v3991_v57 = vadd.f32 %v2956_v33, %v1744_v25 }
 0x21f   : > { %v3117_v31 = vmax.f32 %v3081_v17, 0.0  ;;  %v3082_v47 = vadd.f32 %v3990_v55, %v5304_v2 }
 0x220   : > { %v3808_v13 = vpop.f32.mrb[28].mxu1  ;;  %v3115_v34 = vmax.f32 %v3079_v18, 0.0  ;;  %v3080_v26 = vadd.f32 %v3991_v57, %v5304_v2 }
 0x221   : > { %v1773_v41 = vpop.f32.mrb[29].mxu1  ;;  %3153 = vst [vmem:[%s5310_s20 + $0xb0] sm:$0xff] %v3117_v31  ;;  %v3118_v50 = vmax.f32 %v3082_v47, 0.0 }
 0x222   : > { %v3809_v46 = vpop.f32.mrb[30].mxu1  ;;  %3151 = vst [vmem:[%s5310_s20 + $0xa0] sm:$0xff] %v3115_v34  ;;  %v3116_v35 = vmax.f32 %v3080_v26, 0.0  ;;  %v3956_v1 = vpop.f32.mrb[24].mxu0 }
 0x223   : > { %v1776_v36 = vpop.f32.mrb[31].mxu1  ;;  %3154 = vst [vmem:[%s5310_s20 + $0xb8] sm:$0xff] %v3118_v50  ;;  %v3992_v12 = vadd.f32 %v3956_v1, %v3804_v45  ;;  %v2969_v24 = vpop.f32.mrb[25].mxu0 }
 0x224   : > { %3152 = vst [vmem:[%s5310_s20 + $0xa8] sm:$0xff] %v3116_v35  ;;  %v3993_v61 = vadd.f32 %v2969_v24, %v1757_v8  ;;  %v3957_v63 = vpop.f32.mrb[26].mxu0 }
 0x225   : > { %v3085_v37 = vadd.f32 %v3992_v12, %v5304_v2  ;;  %v3994_v23 = vadd.f32 %v3957_v63, %v3805_v15  ;;  %v2972_v5 = vpop.f32.mrb[27].mxu0 }
 0x226   : > { %v3083_v0 = vadd.f32 %v3993_v61, %v5304_v2  ;;  %v3995_v58 = vadd.f32 %v2972_v5, %v1760_v11 }
 0x227   : > { %v3121_v56 = vmax.f32 %v3085_v37, 0.0  ;;  %v3086_v14 = vadd.f32 %v3994_v23, %v5304_v2 }
 0x228   : > { %v3812_v53 = vpop.f32.mrb[32].mxu1  ;;  %v3119_v7 = vmax.f32 %v3083_v0, 0.0  ;;  %v3084_v40 = vadd.f32 %v3995_v58, %v5304_v2 }
 0x229   : > { %v1789_v16 = vpop.f32.mrb[33].mxu1  ;;  %3157 = vst [vmem:[%s5310_s20 + $0xd0] sm:$0xff] %v3121_v56  ;;  %v3122_v6 = vmax.f32 %v3086_v14, 0.0 }
 0x22a   : > { %v3813_v52 = vpop.f32.mrb[34].mxu1  ;;  %3155 = vst [vmem:[%s5310_s20 + $0xc0] sm:$0xff] %v3119_v7  ;;  %v3120_v54 = vmax.f32 %v3084_v40, 0.0  ;;  %v3960_v30 = vpop.f32.mrb[28].mxu0 }
 0x22b   : > { %v1792_v10 = vpop.f32.mrb[35].mxu1  ;;  %3158 = vst [vmem:[%s5310_s20 + $0xd8] sm:$0xff] %v3122_v6  ;;  %v3996_v51 = vadd.f32 %v3960_v30, %v3808_v13  ;;  %v2985_v3 = vpop.f32.mrb[29].mxu0 }
 0x22c   : > { %3156 = vst [vmem:[%s5310_s20 + $0xc8] sm:$0xff] %v3120_v54  ;;  %v3997_v25 = vadd.f32 %v2985_v3, %v1773_v41  ;;  %v3961_v29 = vpop.f32.mrb[30].mxu0 }
 0x22d   : > { %v3089_v62 = vadd.f32 %v3996_v51, %v5304_v2  ;;  %v3998_v38 = vadd.f32 %v3961_v29, %v3809_v46  ;;  %v2988_v42 = vpop.f32.mrb[31].mxu0 }
 0x22e   : > { %v3087_v20 = vadd.f32 %v3997_v25, %v5304_v2  ;;  %v3999_v49 = vadd.f32 %v2988_v42, %v1776_v36 }
 0x22f   : > { %v3125_v27 = vmax.f32 %v3089_v62, 0.0  ;;  %v3090_v44 = vadd.f32 %v3998_v38, %v5304_v2 }
 0x230   : > { %v3123_v19 = vmax.f32 %v3087_v20, 0.0  ;;  %v3088_v4 = vadd.f32 %v3999_v49, %v5304_v2 }
 0x231   : > { %3161 = vst [vmem:[%s5310_s20 + $0xf0] sm:$0xff] %v3125_v27  ;;  %v3126_v48 = vmax.f32 %v3090_v44, 0.0 }
 0x232   : > { %3159 = vst [vmem:[%s5310_s20 + $0xe0] sm:$0xff] %v3123_v19  ;;  %v3124_v45 = vmax.f32 %v3088_v4, 0.0  ;;  %v3964_v21 = vpop.f32.mrb[32].mxu0 }
 0x233   : > { %3162 = vst [vmem:[%s5310_s20 + $0xf8] sm:$0xff] %v3126_v48  ;;  %v4000_v59 = vadd.f32 %v3964_v21, %v3812_v53  ;;  %v3001_v8 = vpop.f32.mrb[33].mxu0 }
 0x234   : > { %3160 = vst [vmem:[%s5310_s20 + $0xe8] sm:$0xff] %v3124_v45  ;;  %v4001_v43 = vadd.f32 %v3001_v8, %v1789_v16  ;;  %v3965_v15 = vpop.f32.mrb[34].mxu0 }
 0x235   : > { %v3093_v22 = vadd.f32 %v4000_v59, %v5304_v2  ;;  %v4002_v39 = vadd.f32 %v3965_v15, %v3813_v52  ;;  %v3004_v11 = vpop.f32.mrb[35].mxu0 }
 0x236   : > { %v3091_v60 = vadd.f32 %v4001_v43, %v5304_v2  ;;  %v4003_v28 = vadd.f32 %v3004_v11, %v1792_v10 }
 0x237   : > { %v3129_v32 = vmax.f32 %v3093_v22, 0.0  ;;  %v3094_v9 = vadd.f32 %v4002_v39, %v5304_v2 }
 0x238   : > { %v3127_v17 = vmax.f32 %v3091_v60, 0.0  ;;  %v3092_v55 = vadd.f32 %v4003_v28, %v5304_v2 }
 0x239   : > { %3165 = vst [vmem:[%s5310_s20 + $0x110] sm:$0xff] %v3129_v32  ;;  %v3130_v33 = vmax.f32 %v3094_v9, 0.0 }
 0x23a   : > { %3163 = vst [vmem:[%s5310_s20 + $0x100] sm:$0xff] %v3127_v17  ;;  %v3128_v18 = vmax.f32 %v3092_v55, 0.0 }
 0x23b   : > { %3166 = vst [vmem:[%s5310_s20 + $0x118] sm:$0xff] %v3130_v33 }
 0x23c   : > { %3164 = vst [vmem:[%s5310_s20 + $0x108] sm:$0xff] %v3128_v18 }
 0x23d PF: > { %s13_s14 = sadd.s32 1, %s4337_s14   ;;  %s5471_s12 = smov %s4333_s13 }
 0x23e   : > { %p10_p5 = scmp.ge.s32.totalorder %s13_s14, 4   ;;  %s5472_s13 = smov %s5474_s15 }
 0x240   :  { %12 = sbr.rel (!%p10_p5) target bundleno = 2 (0x2), region = 71 }

</bundles_post_ra>
